<compile_context>
chip_gen: v7x
topology: tpu7x:2x2x1
jax: 0.10.0
libtpu: 0.0.40
codegen_flags: <defaults>
</compile_context>

<pallas_src>
import functools

import jax
import jax.numpy as jnp
from jax.experimental import pallas as pl
from jax.experimental.pallas import tpu as pltpu


# ---------------------------------------------------------------------------
# Fused Upnet kernel (one batch element per grid step)
# ---------------------------------------------------------------------------
def _upnet_kernel(x_ref, w1_ref, b1_ref, w2_ref, b2_ref, w3_ref, b3_ref,
                  o_ref, *, G0, H, W):
    HW = H * W
    f32 = jnp.float32

    # x-coordinate of every flattened spatial position (lane axis), hoisted
    # out of all loops (JAX does not CSE broadcasts).
    lane = jax.lax.broadcasted_iota(jnp.int32, (1, HW), 1)
    col_idx = lane % W
    not_left = col_idx > 0          # x-1 stays inside the row
    not_right = col_idx < (W - 1)   # x+1 stays inside the row

    def shift_tap(plane, a, b):
        # plane: (C, H*W) flat image on the base grid.  Returns the tap
        # value[c, y*W+x] = plane[c, (y+a)*W + (x+b)] with zero padding at the
        # image border ("same" conv semantics).  a, b in {-1, 0, 1}.
        c = plane.shape[0]
        s = a * W + b
        if s > 0:
            shifted = jnp.concatenate(
                [plane[:, s:], jnp.zeros((c, s), plane.dtype)], axis=1)
        elif s < 0:
            shifted = jnp.concatenate(
                [jnp.zeros((c, -s), plane.dtype), plane[:, :s]], axis=1)
        else:
            shifted = plane
        if b == 1:
            shifted = jnp.where(not_right, shifted, 0.0)
        elif b == -1:
            shifted = jnp.where(not_left, shifted, 0.0)
        return shifted

    def polyphase_conv3x3(phases, r, wmat, bias):
        # 3x3 "same" conv on an (r*H, r*W) image given in polyphase form:
        #   phases[(ty, tx)][c, y*W + x] == image[c, r*y + ty, r*x + tx]
        # wmat: (Cout, 9*Cin) with rows ordered ((dy+1)*3 + (dx+1))*Cin + ci.
        # Returns the conv output in the same polyphase representation.
        cache = {}

        def tap(ty, tx, a, b):
            key = (ty, tx, a, b)
            if key not in cache:
                cache[key] = shift_tap(phases[(ty, tx)], a, b)
            return cache[key]

        out = {}
        for sy in range(r):
            for sx in range(r):
                cols = []
                for dy in (-1, 0, 1):
                    ty = (sy + dy) % r
                    a = (sy + dy - ty) // r
                    for dx in (-1, 0, 1):
                        tx = (sx + dx) % r
                        b = (sx + dx - tx) // r
                        cols.append(tap(ty, tx, a, b))
                col = jnp.concatenate(cols, axis=0)            # (9*Cin, HW)
                out[(sy, sx)] = (
                    jnp.dot(wmat, col, preferred_element_type=f32) + bias)
        return out

    x = x_ref[0].astype(f32)                                   # (G0, HW)
    w1 = w1_ref[...].astype(f32)
    b1 = b1_ref[...].astype(f32)
    w2 = w2_ref[...].astype(f32)
    b2 = b2_ref[...].astype(f32)
    w3 = w3_ref[...].astype(f32)
    b3 = b3_ref[...].astype(f32)

    # --- conv1 on the base HxW grid (single phase) --------------------------
    y1 = polyphase_conv3x3({(0, 0): x}, 1, w1, b1)[(0, 0)]     # (4*G0, HW)

    # --- PixelShuffle(2): pure bookkeeping.  Weights were permuted so group
    #     k = 2*i + j occupies rows [k*G0, (k+1)*G0) of y1 (sublane aligned).
    p1 = {(i, j): y1[(2 * i + j) * G0:(2 * i + j + 1) * G0, :]
          for i in range(2) for j in range(2)}

    # --- conv2 on the 2Hx2W grid (4 polyphase planes) -----------------------
    o2 = polyphase_conv3x3(p1, 2, w2, b2)                      # 4 x (4*G0, HW)

    # --- second PixelShuffle(2): regroup into 16 phases of the 4Hx4W grid ---
    p2 = {}
    for ry in range(4):
        for rx in range(4):
            k2 = 2 * (ry % 2) + (rx % 2)
            p2[(ry, rx)] = o2[(ry // 2, rx // 2)][k2 * G0:(k2 + 1) * G0, :]

    # --- conv3 on the 4Hx4W grid (16 polyphase planes) -> output phases -----
    o3 = polyphase_conv3x3(p2, 4, w3, b3)                      # 16 x (C3, HW)

    for sy in range(4):
        for sx in range(4):
            o_ref[0, sy * 4 + sx, :, :] = o3[(sy, sx)].astype(o_ref.dtype)


# ---------------------------------------------------------------------------
# Wrapper: weight prep (im2col + sub-pixel permutation) + pallas_call
# ---------------------------------------------------------------------------
def _im2col_weights(w_oihw, b, permute_for_shuffle):
    # w_oihw: (Cout, Cin, 3, 3) PyTorch Conv2d layout.
    cout, cin = w_oihw.shape[0], w_oihw.shape[1]
    if permute_for_shuffle:
        # Reorder output channels from PyTorch's c*4 + (2*i + j) to
        # (2*i + j)*G + c so each PixelShuffle sub-pixel group is contiguous.
        g = cout // 4
        perm = jnp.arange(cout).reshape(g, 4).T.reshape(-1)
        w_oihw = w_oihw[perm]
        b = b[perm]
    wmat = jnp.transpose(w_oihw, (0, 2, 3, 1)).reshape(cout, 9 * cin)
    return wmat, b.reshape(cout, 1)


@jax.jit
def upnet_forward(x_nchw, params):
    N, G0, H, W = x_nchw.shape
    HW = H * W

    w1m, b1m = _im2col_weights(params["w1"], params["b1"], True)
    w2m, b2m = _im2col_weights(params["w2"], params["b2"], True)
    w3m, b3m = _im2col_weights(params["w3"], params["b3"], False)
    C3 = w3m.shape[0]

    kernel = functools.partial(_upnet_kernel, G0=G0, H=H, W=W)

    out = pl.pallas_call(
        kernel,
        out_shape=jax.ShapeDtypeStruct((N, 16, C3, HW), x_nchw.dtype),
        grid_spec=pltpu.PrefetchScalarGridSpec(
            num_scalar_prefetch=0,
            grid=(N,),
            in_specs=[
                pl.BlockSpec((1, G0, HW), lambda n: (n, 0, 0)),
                pl.BlockSpec((4 * G0, 9 * G0), lambda n: (0, 0)),
                pl.BlockSpec((4 * G0, 1), lambda n: (0, 0)),
                pl.BlockSpec((4 * G0, 9 * G0), lambda n: (0, 0)),
                pl.BlockSpec((4 * G0, 1), lambda n: (0, 0)),
                pl.BlockSpec((C3, 9 * G0), lambda n: (0, 0)),
                pl.BlockSpec((C3, 1), lambda n: (0, 0)),
            ],
            out_specs=pl.BlockSpec((1, 16, C3, HW), lambda n: (n, 0, 0, 0)),
        ),
        compiler_params=pltpu.CompilerParams(
            dimension_semantics=("parallel",),
        ),
    )(x_nchw.reshape(N, G0, HW), w1m, b1m, w2m, b2m, w3m, b3m)

    # (n, sy, sx, co, y, x) -> (n, co, y, sy, x, sx) -> (N, C, 4H, 4W)
    out = out.reshape(N, 4, 4, C3, H, W)
    out = jnp.transpose(out, (0, 3, 4, 1, 5, 2))
    return out.reshape(N, C3, 4 * H, 4 * W)


# ---------------------------------------------------------------------------
# Parameter init (PyTorch Conv2d convention: OIHW weights, uniform +-1/sqrt(fan_in))
# ---------------------------------------------------------------------------
def init_upnet_params(key, num_channels, num_features):
    G0 = num_features
    ks = jax.random.split(key, 6)

    def conv_init(kw, kb, cin, cout):
        scale = 1.0 / (cin * 9.0) ** 0.5
        w = jax.random.uniform(kw, (cout, cin, 3, 3), jnp.float32, -scale, scale)
        b = jax.random.uniform(kb, (cout,), jnp.float32, -scale, scale)
        return w, b

    w1, b1 = conv_init(ks[0], ks[1], G0, 4 * G0)
    w2, b2 = conv_init(ks[2], ks[3], G0, 4 * G0)
    w3, b3 = conv_init(ks[4], ks[5], G0, num_channels)
    return {"w1": w1, "b1": b1, "w2": w2, "b2": b2, "w3": w3, "b3": b3}


# ---------------------------------------------------------------------------
# Plain-JAX reference (mirrors the PyTorch module) for a runtime sanity check
# ---------------------------------------------------------------------------
def upnet_reference(x, params):
    def conv3x3(x, w, b):
        y = jax.lax.conv_general_dilated(
            x, w, window_strides=(1, 1), padding=((1, 1), (1, 1)),
            dimension_numbers=("NCHW", "OIHW", "NCHW"))
        return y + b[None, :, None, None]

    def pixel_shuffle(x, r=2):
        N, C, H, W = x.shape
        x = x.reshape(N, C // (r * r), r, r, H, W)
        x = jnp.transpose(x, (0, 1, 4, 2, 5, 3))
        return x.reshape(N, C // (r * r), H * r, W * r)

    x = pixel_shuffle(conv3x3(x, params["w1"], params["b1"]))
    x = pixel_shuffle(conv3x3(x, params["w2"], params["b2"]))
    return conv3x3(x, params["w3"], params["b3"])


if __name__ == "__main__":
    num_channels = 3   # output image channels
    num_features = 8   # G0
    N, H, W = 2, 16, 16

    key = jax.random.PRNGKey(0)
    k_x, k_p = jax.random.split(key)
    x = jax.random.normal(k_x, (N, num_features, H, W), dtype=jnp.float32)
    params = init_upnet_params(k_p, num_channels, num_features)

    y = upnet_forward(x, params)
    jax.block_until_ready(y)
    assert y.shape == (N, num_channels, 4 * H, 4 * W), y.shape

    # Sanity check the fused polyphase kernel against the straightforward
    # XLA implementation of the same module.
    y_ref = upnet_reference(x, params)
    err = float(jnp.max(jnp.abs(y - y_ref)))
    assert err < 1e-1, f"max abs err vs reference: {err}"

    print("KERNEL_OK")
</pallas_src>

<mosaic_0001>
module attributes {stable_mosaic.version = 11 : i64} {
  func.func @_upnet_kernel(%arg0: i32, %arg1: memref<1x8x256xf32, #tpu.memory_space<vmem>>, %arg2: memref<32x72xf32, #tpu.memory_space<vmem>>, %arg3: memref<32x1xf32, #tpu.memory_space<vmem>>, %arg4: memref<32x72xf32, #tpu.memory_space<vmem>>, %arg5: memref<32x1xf32, #tpu.memory_space<vmem>>, %arg6: memref<3x72xf32, #tpu.memory_space<vmem>>, %arg7: memref<3x1xf32, #tpu.memory_space<vmem>>, %arg8: memref<1x16x3x256xf32, #tpu.memory_space<vmem>>) attributes {dimension_semantics = [#tpu.dimension_semantics<parallel>], iteration_bounds = array<i64: 2>, scalar_prefetch = 0 : i64, scratch_operands = 0 : i64, tpu.core_type = #tpu.core_type<tc>, window_params = [{transform_indices = @transform_0, window_bounds = array<i64: 1, 8, 256>}, {pipeline_mode = #tpu.pipeline_mode<synchronous>, transform_indices = @transform_1, window_bounds = array<i64: 32, 72>}, {pipeline_mode = #tpu.pipeline_mode<synchronous>, transform_indices = @transform_2, window_bounds = array<i64: 32, 1>}, {pipeline_mode = #tpu.pipeline_mode<synchronous>, transform_indices = @transform_3, window_bounds = array<i64: 32, 72>}, {pipeline_mode = #tpu.pipeline_mode<synchronous>, transform_indices = @transform_4, window_bounds = array<i64: 32, 1>}, {pipeline_mode = #tpu.pipeline_mode<synchronous>, transform_indices = @transform_5, window_bounds = array<i64: 3, 72>}, {pipeline_mode = #tpu.pipeline_mode<synchronous>, transform_indices = @transform_6, window_bounds = array<i64: 3, 1>}, {transform_indices = @transform_7, window_bounds = array<i64: 1, 16, 3, 256>}]} {
    %0 = tpu.iota {dimensions = array<i32: 1>} : vector<1x256xi32>
    %c16_i32 = arith.constant 16 : i32
    %c0_i32 = arith.constant 0 : i32
    %1 = arith.cmpi eq, %c16_i32, %c0_i32 : i32
    %c1_i32 = arith.constant 1 : i32
    %2 = arith.select %1, %c1_i32, %c16_i32 : i32
    %3 = vector.broadcast %2 : i32 to vector<1x256xi32>
    %4 = arith.remsi %0, %3 : vector<1x256xi32>
    %c0_i32_0 = arith.constant 0 : i32
    %5 = vector.broadcast %c0_i32_0 : i32 to vector<1x256xi32>
    %6 = arith.cmpi ne, %4, %5 : vector<1x256xi32>
    %c0_i32_1 = arith.constant 0 : i32
    %7 = vector.broadcast %c0_i32_1 : i32 to vector<1x256xi32>
    %8 = arith.cmpi slt, %4, %7 : vector<1x256xi32>
    %c0_i32_2 = arith.constant 0 : i32
    %9 = arith.cmpi slt, %2, %c0_i32_2 : i32
    %10 = vector.broadcast %9 : i1 to vector<1x256xi1>
    %11 = vector.broadcast %10 : vector<1x256xi1> to vector<1x256xi1>
    %12 = arith.xori %8, %11 : vector<1x256xi1>
    %13 = arith.andi %12, %6 : vector<1x256xi1>
    %14 = vector.broadcast %2 : i32 to vector<1x256xi32>
    %15 = arith.addi %4, %14 : vector<1x256xi32>
    %16 = arith.select %13, %15, %4 : vector<1x256xi1>, vector<1x256xi32>
    %c0_i32_3 = arith.constant 0 : i32
    %17 = vector.broadcast %c0_i32_3 : i32 to vector<1x256xi32>
    %18 = arith.cmpi sgt, %16, %17 : vector<1x256xi32>
    %c15_i32 = arith.constant 15 : i32
    %19 = vector.broadcast %c15_i32 : i32 to vector<1x256xi32>
    %20 = arith.cmpi slt, %16, %19 : vector<1x256xi32>
    %c0 = arith.constant 0 : index
    %c0_4 = arith.constant 0 : index
    %c0_5 = arith.constant 0 : index
    %21 = vector.load %arg1[%c0, %c0_4, %c0_5] : memref<1x8x256xf32, #tpu.memory_space<vmem>>, vector<1x8x256xf32>
    %22 = vector.shape_cast %21 : vector<1x8x256xf32> to vector<8x256xf32>
    %c0_6 = arith.constant 0 : index
    %c0_7 = arith.constant 0 : index
    %23 = vector.load %arg2[%c0_6, %c0_7] : memref<32x72xf32, #tpu.memory_space<vmem>>, vector<32x72xf32>
    %c0_8 = arith.constant 0 : index
    %c0_9 = arith.constant 0 : index
    %24 = vector.load %arg3[%c0_8, %c0_9] : memref<32x1xf32, #tpu.memory_space<vmem>>, vector<32x1xf32>
    %c0_10 = arith.constant 0 : index
    %c0_11 = arith.constant 0 : index
    %25 = vector.load %arg4[%c0_10, %c0_11] : memref<32x72xf32, #tpu.memory_space<vmem>>, vector<32x72xf32>
    %c0_12 = arith.constant 0 : index
    %c0_13 = arith.constant 0 : index
    %26 = vector.load %arg5[%c0_12, %c0_13] : memref<32x1xf32, #tpu.memory_space<vmem>>, vector<32x1xf32>
    %c0_14 = arith.constant 0 : index
    %c0_15 = arith.constant 0 : index
    %27 = vector.load %arg6[%c0_14, %c0_15] : memref<3x72xf32, #tpu.memory_space<vmem>>, vector<3x72xf32>
    %c0_16 = arith.constant 0 : index
    %c0_17 = arith.constant 0 : index
    %28 = vector.load %arg7[%c0_16, %c0_17] : memref<3x1xf32, #tpu.memory_space<vmem>>, vector<3x1xf32>
    %cst = arith.constant 0.000000e+00 : f32
    %29 = vector.broadcast %cst : f32 to vector<8x17xf32>
    %30 = vector.extract_strided_slice %22 {offsets = [0, 0], sizes = [8, 239], strides = [1, 1]} : vector<8x256xf32> to vector<8x239xf32>
    %31 = tpu.concatenate %29, %30 in 1 : vector<8x17xf32>, vector<8x239xf32> -> vector<8x256xf32>
    %cst_18 = arith.constant 0.000000e+00 : f32
    %32 = vector.shape_cast %18 : vector<1x256xi1> to vector<1x256xi1>
    %33 = vector.broadcast %32 : vector<1x256xi1> to vector<8x256xi1>
    %34 = vector.broadcast %cst_18 : f32 to vector<8x256xf32>
    %35 = arith.select %33, %31, %34 : vector<8x256xi1>, vector<8x256xf32>
    %cst_19 = arith.constant 0.000000e+00 : f32
    %36 = vector.broadcast %cst_19 : f32 to vector<8x16xf32>
    %37 = vector.extract_strided_slice %22 {offsets = [0, 0], sizes = [8, 240], strides = [1, 1]} : vector<8x256xf32> to vector<8x240xf32>
    %38 = tpu.concatenate %36, %37 in 1 : vector<8x16xf32>, vector<8x240xf32> -> vector<8x256xf32>
    %cst_20 = arith.constant 0.000000e+00 : f32
    %39 = vector.broadcast %cst_20 : f32 to vector<8x15xf32>
    %40 = vector.extract_strided_slice %22 {offsets = [0, 0], sizes = [8, 241], strides = [1, 1]} : vector<8x256xf32> to vector<8x241xf32>
    %41 = tpu.concatenate %39, %40 in 1 : vector<8x15xf32>, vector<8x241xf32> -> vector<8x256xf32>
    %cst_21 = arith.constant 0.000000e+00 : f32
    %42 = vector.shape_cast %20 : vector<1x256xi1> to vector<1x256xi1>
    %43 = vector.broadcast %42 : vector<1x256xi1> to vector<8x256xi1>
    %44 = vector.broadcast %cst_21 : f32 to vector<8x256xf32>
    %45 = arith.select %43, %41, %44 : vector<8x256xi1>, vector<8x256xf32>
    %cst_22 = arith.constant 0.000000e+00 : f32
    %46 = vector.broadcast %cst_22 : f32 to vector<8x1xf32>
    %47 = vector.extract_strided_slice %22 {offsets = [0, 0], sizes = [8, 255], strides = [1, 1]} : vector<8x256xf32> to vector<8x255xf32>
    %48 = tpu.concatenate %46, %47 in 1 : vector<8x1xf32>, vector<8x255xf32> -> vector<8x256xf32>
    %cst_23 = arith.constant 0.000000e+00 : f32
    %49 = vector.shape_cast %18 : vector<1x256xi1> to vector<1x256xi1>
    %50 = vector.broadcast %49 : vector<1x256xi1> to vector<8x256xi1>
    %51 = vector.broadcast %cst_23 : f32 to vector<8x256xf32>
    %52 = arith.select %50, %48, %51 : vector<8x256xi1>, vector<8x256xf32>
    %53 = vector.extract_strided_slice %22 {offsets = [0, 1], sizes = [8, 255], strides = [1, 1]} : vector<8x256xf32> to vector<8x255xf32>
    %cst_24 = arith.constant 0.000000e+00 : f32
    %54 = vector.broadcast %cst_24 : f32 to vector<8x1xf32>
    %55 = tpu.concatenate %53, %54 in 1 : vector<8x255xf32>, vector<8x1xf32> -> vector<8x256xf32>
    %cst_25 = arith.constant 0.000000e+00 : f32
    %56 = vector.shape_cast %20 : vector<1x256xi1> to vector<1x256xi1>
    %57 = vector.broadcast %56 : vector<1x256xi1> to vector<8x256xi1>
    %58 = vector.broadcast %cst_25 : f32 to vector<8x256xf32>
    %59 = arith.select %57, %55, %58 : vector<8x256xi1>, vector<8x256xf32>
    %60 = vector.extract_strided_slice %22 {offsets = [0, 15], sizes = [8, 241], strides = [1, 1]} : vector<8x256xf32> to vector<8x241xf32>
    %cst_26 = arith.constant 0.000000e+00 : f32
    %61 = vector.broadcast %cst_26 : f32 to vector<8x15xf32>
    %62 = tpu.concatenate %60, %61 in 1 : vector<8x241xf32>, vector<8x15xf32> -> vector<8x256xf32>
    %cst_27 = arith.constant 0.000000e+00 : f32
    %63 = vector.shape_cast %18 : vector<1x256xi1> to vector<1x256xi1>
    %64 = vector.broadcast %63 : vector<1x256xi1> to vector<8x256xi1>
    %65 = vector.broadcast %cst_27 : f32 to vector<8x256xf32>
    %66 = arith.select %64, %62, %65 : vector<8x256xi1>, vector<8x256xf32>
    %67 = vector.extract_strided_slice %22 {offsets = [0, 16], sizes = [8, 240], strides = [1, 1]} : vector<8x256xf32> to vector<8x240xf32>
    %cst_28 = arith.constant 0.000000e+00 : f32
    %68 = vector.broadcast %cst_28 : f32 to vector<8x16xf32>
    %69 = tpu.concatenate %67, %68 in 1 : vector<8x240xf32>, vector<8x16xf32> -> vector<8x256xf32>
    %70 = vector.extract_strided_slice %22 {offsets = [0, 17], sizes = [8, 239], strides = [1, 1]} : vector<8x256xf32> to vector<8x239xf32>
    %cst_29 = arith.constant 0.000000e+00 : f32
    %71 = vector.broadcast %cst_29 : f32 to vector<8x17xf32>
    %72 = tpu.concatenate %70, %71 in 1 : vector<8x239xf32>, vector<8x17xf32> -> vector<8x256xf32>
    %cst_30 = arith.constant 0.000000e+00 : f32
    %73 = vector.shape_cast %20 : vector<1x256xi1> to vector<1x256xi1>
    %74 = vector.broadcast %73 : vector<1x256xi1> to vector<8x256xi1>
    %75 = vector.broadcast %cst_30 : f32 to vector<8x256xf32>
    %76 = arith.select %74, %72, %75 : vector<8x256xi1>, vector<8x256xf32>
    %77 = tpu.concatenate %35, %38, %45, %52, %22, %59, %66, %69, %76 in 0 : vector<8x256xf32>, vector<8x256xf32>, vector<8x256xf32>, vector<8x256xf32>, vector<8x256xf32>, vector<8x256xf32>, vector<8x256xf32>, vector<8x256xf32>, vector<8x256xf32> -> vector<72x256xf32>
    %cst_31 = arith.constant dense<0.000000e+00> : vector<32x256xf32>
    %78 = tpu.matmul %23, %77, %cst_31 {dimension_numbers = #tpu.dot_dimension_numbers<[1], [0], [0], [1], [0, 0, 1, 1], [], []>} : vector<32x72xf32>, vector<72x256xf32>, vector<32x256xf32> -> vector<32x256xf32>
    %79 = vector.broadcast %24 : vector<32x1xf32> to vector<32x256xf32>
    %80 = arith.addf %78, %79 : vector<32x256xf32>
    %81 = vector.extract_strided_slice %80 {offsets = [0, 0], sizes = [8, 256], strides = [1, 1]} : vector<32x256xf32> to vector<8x256xf32>
    %82 = vector.extract_strided_slice %80 {offsets = [8, 0], sizes = [8, 256], strides = [1, 1]} : vector<32x256xf32> to vector<8x256xf32>
    %83 = vector.extract_strided_slice %80 {offsets = [16, 0], sizes = [8, 256], strides = [1, 1]} : vector<32x256xf32> to vector<8x256xf32>
    %84 = vector.extract_strided_slice %80 {offsets = [24, 0], sizes = [8, 256], strides = [1, 1]} : vector<32x256xf32> to vector<8x256xf32>
    %cst_32 = arith.constant 0.000000e+00 : f32
    %85 = vector.broadcast %cst_32 : f32 to vector<8x17xf32>
    %86 = vector.extract_strided_slice %84 {offsets = [0, 0], sizes = [8, 239], strides = [1, 1]} : vector<8x256xf32> to vector<8x239xf32>
    %87 = tpu.concatenate %85, %86 in 1 : vector<8x17xf32>, vector<8x239xf32> -> vector<8x256xf32>
    %cst_33 = arith.constant 0.000000e+00 : f32
    %88 = vector.shape_cast %18 : vector<1x256xi1> to vector<1x256xi1>
    %89 = vector.broadcast %88 : vector<1x256xi1> to vector<8x256xi1>
    %90 = vector.broadcast %cst_33 : f32 to vector<8x256xf32>
    %91 = arith.select %89, %87, %90 : vector<8x256xi1>, vector<8x256xf32>
    %cst_34 = arith.constant 0.000000e+00 : f32
    %92 = vector.broadcast %cst_34 : f32 to vector<8x16xf32>
    %93 = vector.extract_strided_slice %83 {offsets = [0, 0], sizes = [8, 240], strides = [1, 1]} : vector<8x256xf32> to vector<8x240xf32>
    %94 = tpu.concatenate %92, %93 in 1 : vector<8x16xf32>, vector<8x240xf32> -> vector<8x256xf32>
    %cst_35 = arith.constant 0.000000e+00 : f32
    %95 = vector.broadcast %cst_35 : f32 to vector<8x16xf32>
    %96 = vector.extract_strided_slice %84 {offsets = [0, 0], sizes = [8, 240], strides = [1, 1]} : vector<8x256xf32> to vector<8x240xf32>
    %97 = tpu.concatenate %95, %96 in 1 : vector<8x16xf32>, vector<8x240xf32> -> vector<8x256xf32>
    %cst_36 = arith.constant 0.000000e+00 : f32
    %98 = vector.broadcast %cst_36 : f32 to vector<8x1xf32>
    %99 = vector.extract_strided_slice %82 {offsets = [0, 0], sizes = [8, 255], strides = [1, 1]} : vector<8x256xf32> to vector<8x255xf32>
    %100 = tpu.concatenate %98, %99 in 1 : vector<8x1xf32>, vector<8x255xf32> -> vector<8x256xf32>
    %cst_37 = arith.constant 0.000000e+00 : f32
    %101 = vector.shape_cast %18 : vector<1x256xi1> to vector<1x256xi1>
    %102 = vector.broadcast %101 : vector<1x256xi1> to vector<8x256xi1>
    %103 = vector.broadcast %cst_37 : f32 to vector<8x256xf32>
    %104 = arith.select %102, %100, %103 : vector<8x256xi1>, vector<8x256xf32>
    %cst_38 = arith.constant 0.000000e+00 : f32
    %105 = vector.broadcast %cst_38 : f32 to vector<8x1xf32>
    %106 = vector.extract_strided_slice %84 {offsets = [0, 0], sizes = [8, 255], strides = [1, 1]} : vector<8x256xf32> to vector<8x255xf32>
    %107 = tpu.concatenate %105, %106 in 1 : vector<8x1xf32>, vector<8x255xf32> -> vector<8x256xf32>
    %cst_39 = arith.constant 0.000000e+00 : f32
    %108 = vector.shape_cast %18 : vector<1x256xi1> to vector<1x256xi1>
    %109 = vector.broadcast %108 : vector<1x256xi1> to vector<8x256xi1>
    %110 = vector.broadcast %cst_39 : f32 to vector<8x256xf32>
    %111 = arith.select %109, %107, %110 : vector<8x256xi1>, vector<8x256xf32>
    %112 = tpu.concatenate %91, %94, %97, %104, %81, %82, %111, %83, %84 in 0 : vector<8x256xf32>, vector<8x256xf32>, vector<8x256xf32>, vector<8x256xf32>, vector<8x256xf32>, vector<8x256xf32>, vector<8x256xf32>, vector<8x256xf32>, vector<8x256xf32> -> vector<72x256xf32>
    %cst_40 = arith.constant dense<0.000000e+00> : vector<32x256xf32>
    %113 = tpu.matmul %25, %112, %cst_40 {dimension_numbers = #tpu.dot_dimension_numbers<[1], [0], [0], [1], [0, 0, 1, 1], [], []>} : vector<32x72xf32>, vector<72x256xf32>, vector<32x256xf32> -> vector<32x256xf32>
    %114 = vector.broadcast %26 : vector<32x1xf32> to vector<32x256xf32>
    %115 = arith.addf %113, %114 : vector<32x256xf32>
    %cst_41 = arith.constant 0.000000e+00 : f32
    %116 = vector.broadcast %cst_41 : f32 to vector<8x15xf32>
    %117 = vector.extract_strided_slice %83 {offsets = [0, 0], sizes = [8, 241], strides = [1, 1]} : vector<8x256xf32> to vector<8x241xf32>
    %118 = tpu.concatenate %116, %117 in 1 : vector<8x15xf32>, vector<8x241xf32> -> vector<8x256xf32>
    %cst_42 = arith.constant 0.000000e+00 : f32
    %119 = vector.shape_cast %20 : vector<1x256xi1> to vector<1x256xi1>
    %120 = vector.broadcast %119 : vector<1x256xi1> to vector<8x256xi1>
    %121 = vector.broadcast %cst_42 : f32 to vector<8x256xf32>
    %122 = arith.select %120, %118, %121 : vector<8x256xi1>, vector<8x256xf32>
    %123 = vector.extract_strided_slice %81 {offsets = [0, 1], sizes = [8, 255], strides = [1, 1]} : vector<8x256xf32> to vector<8x255xf32>
    %cst_43 = arith.constant 0.000000e+00 : f32
    %124 = vector.broadcast %cst_43 : f32 to vector<8x1xf32>
    %125 = tpu.concatenate %123, %124 in 1 : vector<8x255xf32>, vector<8x1xf32> -> vector<8x256xf32>
    %cst_44 = arith.constant 0.000000e+00 : f32
    %126 = vector.shape_cast %20 : vector<1x256xi1> to vector<1x256xi1>
    %127 = vector.broadcast %126 : vector<1x256xi1> to vector<8x256xi1>
    %128 = vector.broadcast %cst_44 : f32 to vector<8x256xf32>
    %129 = arith.select %127, %125, %128 : vector<8x256xi1>, vector<8x256xf32>
    %130 = vector.extract_strided_slice %83 {offsets = [0, 1], sizes = [8, 255], strides = [1, 1]} : vector<8x256xf32> to vector<8x255xf32>
    %cst_45 = arith.constant 0.000000e+00 : f32
    %131 = vector.broadcast %cst_45 : f32 to vector<8x1xf32>
    %132 = tpu.concatenate %130, %131 in 1 : vector<8x255xf32>, vector<8x1xf32> -> vector<8x256xf32>
    %cst_46 = arith.constant 0.000000e+00 : f32
    %133 = vector.shape_cast %20 : vector<1x256xi1> to vector<1x256xi1>
    %134 = vector.broadcast %133 : vector<1x256xi1> to vector<8x256xi1>
    %135 = vector.broadcast %cst_46 : f32 to vector<8x256xf32>
    %136 = arith.select %134, %132, %135 : vector<8x256xi1>, vector<8x256xf32>
    %137 = tpu.concatenate %94, %97, %122, %81, %82, %129, %83, %84, %136 in 0 : vector<8x256xf32>, vector<8x256xf32>, vector<8x256xf32>, vector<8x256xf32>, vector<8x256xf32>, vector<8x256xf32>, vector<8x256xf32>, vector<8x256xf32>, vector<8x256xf32> -> vector<72x256xf32>
    %cst_47 = arith.constant dense<0.000000e+00> : vector<32x256xf32>
    %138 = tpu.matmul %25, %137, %cst_47 {dimension_numbers = #tpu.dot_dimension_numbers<[1], [0], [0], [1], [0, 0, 1, 1], [], []>} : vector<32x72xf32>, vector<72x256xf32>, vector<32x256xf32> -> vector<32x256xf32>
    %139 = vector.broadcast %26 : vector<32x1xf32> to vector<32x256xf32>
    %140 = arith.addf %138, %139 : vector<32x256xf32>
    %141 = vector.extract_strided_slice %82 {offsets = [0, 15], sizes = [8, 241], strides = [1, 1]} : vector<8x256xf32> to vector<8x241xf32>
    %cst_48 = arith.constant 0.000000e+00 : f32
    %142 = vector.broadcast %cst_48 : f32 to vector<8x15xf32>
    %143 = tpu.concatenate %141, %142 in 1 : vector<8x241xf32>, vector<8x15xf32> -> vector<8x256xf32>
    %cst_49 = arith.constant 0.000000e+00 : f32
    %144 = vector.shape_cast %18 : vector<1x256xi1> to vector<1x256xi1>
    %145 = vector.broadcast %144 : vector<1x256xi1> to vector<8x256xi1>
    %146 = vector.broadcast %cst_49 : f32 to vector<8x256xf32>
    %147 = arith.select %145, %143, %146 : vector<8x256xi1>, vector<8x256xf32>
    %148 = vector.extract_strided_slice %81 {offsets = [0, 16], sizes = [8, 240], strides = [1, 1]} : vector<8x256xf32> to vector<8x240xf32>
    %cst_50 = arith.constant 0.000000e+00 : f32
    %149 = vector.broadcast %cst_50 : f32 to vector<8x16xf32>
    %150 = tpu.concatenate %148, %149 in 1 : vector<8x240xf32>, vector<8x16xf32> -> vector<8x256xf32>
    %151 = vector.extract_strided_slice %82 {offsets = [0, 16], sizes = [8, 240], strides = [1, 1]} : vector<8x256xf32> to vector<8x240xf32>
    %cst_51 = arith.constant 0.000000e+00 : f32
    %152 = vector.broadcast %cst_51 : f32 to vector<8x16xf32>
    %153 = tpu.concatenate %151, %152 in 1 : vector<8x240xf32>, vector<8x16xf32> -> vector<8x256xf32>
    %154 = tpu.concatenate %104, %81, %82, %111, %83, %84, %147, %150, %153 in 0 : vector<8x256xf32>, vector<8x256xf32>, vector<8x256xf32>, vector<8x256xf32>, vector<8x256xf32>, vector<8x256xf32>, vector<8x256xf32>, vector<8x256xf32>, vector<8x256xf32> -> vector<72x256xf32>
    %cst_52 = arith.constant dense<0.000000e+00> : vector<32x256xf32>
    %155 = tpu.matmul %25, %154, %cst_52 {dimension_numbers = #tpu.dot_dimension_numbers<[1], [0], [0], [1], [0, 0, 1, 1], [], []>} : vector<32x72xf32>, vector<72x256xf32>, vector<32x256xf32> -> vector<32x256xf32>
    %156 = vector.broadcast %26 : vector<32x1xf32> to vector<32x256xf32>
    %157 = arith.addf %155, %156 : vector<32x256xf32>
    %158 = vector.extract_strided_slice %81 {offsets = [0, 17], sizes = [8, 239], strides = [1, 1]} : vector<8x256xf32> to vector<8x239xf32>
    %cst_53 = arith.constant 0.000000e+00 : f32
    %159 = vector.broadcast %cst_53 : f32 to vector<8x17xf32>
    %160 = tpu.concatenate %158, %159 in 1 : vector<8x239xf32>, vector<8x17xf32> -> vector<8x256xf32>
    %cst_54 = arith.constant 0.000000e+00 : f32
    %161 = vector.shape_cast %20 : vector<1x256xi1> to vector<1x256xi1>
    %162 = vector.broadcast %161 : vector<1x256xi1> to vector<8x256xi1>
    %163 = vector.broadcast %cst_54 : f32 to vector<8x256xf32>
    %164 = arith.select %162, %160, %163 : vector<8x256xi1>, vector<8x256xf32>
    %165 = tpu.concatenate %81, %82, %129, %83, %84, %136, %150, %153, %164 in 0 : vector<8x256xf32>, vector<8x256xf32>, vector<8x256xf32>, vector<8x256xf32>, vector<8x256xf32>, vector<8x256xf32>, vector<8x256xf32>, vector<8x256xf32>, vector<8x256xf32> -> vector<72x256xf32>
    %cst_55 = arith.constant dense<0.000000e+00> : vector<32x256xf32>
    %166 = tpu.matmul %25, %165, %cst_55 {dimension_numbers = #tpu.dot_dimension_numbers<[1], [0], [0], [1], [0, 0, 1, 1], [], []>} : vector<32x72xf32>, vector<72x256xf32>, vector<32x256xf32> -> vector<32x256xf32>
    %167 = vector.broadcast %26 : vector<32x1xf32> to vector<32x256xf32>
    %168 = arith.addf %166, %167 : vector<32x256xf32>
    %169 = vector.extract_strided_slice %115 {offsets = [0, 0], sizes = [8, 256], strides = [1, 1]} : vector<32x256xf32> to vector<8x256xf32>
    %170 = vector.extract_strided_slice %115 {offsets = [8, 0], sizes = [8, 256], strides = [1, 1]} : vector<32x256xf32> to vector<8x256xf32>
    %171 = vector.extract_strided_slice %140 {offsets = [0, 0], sizes = [8, 256], strides = [1, 1]} : vector<32x256xf32> to vector<8x256xf32>
    %172 = vector.extract_strided_slice %140 {offsets = [8, 0], sizes = [8, 256], strides = [1, 1]} : vector<32x256xf32> to vector<8x256xf32>
    %173 = vector.extract_strided_slice %115 {offsets = [16, 0], sizes = [8, 256], strides = [1, 1]} : vector<32x256xf32> to vector<8x256xf32>
    %174 = vector.extract_strided_slice %115 {offsets = [24, 0], sizes = [8, 256], strides = [1, 1]} : vector<32x256xf32> to vector<8x256xf32>
    %175 = vector.extract_strided_slice %140 {offsets = [16, 0], sizes = [8, 256], strides = [1, 1]} : vector<32x256xf32> to vector<8x256xf32>
    %176 = vector.extract_strided_slice %140 {offsets = [24, 0], sizes = [8, 256], strides = [1, 1]} : vector<32x256xf32> to vector<8x256xf32>
    %177 = vector.extract_strided_slice %157 {offsets = [0, 0], sizes = [8, 256], strides = [1, 1]} : vector<32x256xf32> to vector<8x256xf32>
    %178 = vector.extract_strided_slice %157 {offsets = [8, 0], sizes = [8, 256], strides = [1, 1]} : vector<32x256xf32> to vector<8x256xf32>
    %179 = vector.extract_strided_slice %168 {offsets = [0, 0], sizes = [8, 256], strides = [1, 1]} : vector<32x256xf32> to vector<8x256xf32>
    %180 = vector.extract_strided_slice %168 {offsets = [8, 0], sizes = [8, 256], strides = [1, 1]} : vector<32x256xf32> to vector<8x256xf32>
    %181 = vector.extract_strided_slice %157 {offsets = [16, 0], sizes = [8, 256], strides = [1, 1]} : vector<32x256xf32> to vector<8x256xf32>
    %182 = vector.extract_strided_slice %157 {offsets = [24, 0], sizes = [8, 256], strides = [1, 1]} : vector<32x256xf32> to vector<8x256xf32>
    %183 = vector.extract_strided_slice %168 {offsets = [16, 0], sizes = [8, 256], strides = [1, 1]} : vector<32x256xf32> to vector<8x256xf32>
    %184 = vector.extract_strided_slice %168 {offsets = [24, 0], sizes = [8, 256], strides = [1, 1]} : vector<32x256xf32> to vector<8x256xf32>
    %cst_56 = arith.constant 0.000000e+00 : f32
    %185 = vector.broadcast %cst_56 : f32 to vector<8x17xf32>
    %186 = vector.extract_strided_slice %184 {offsets = [0, 0], sizes = [8, 239], strides = [1, 1]} : vector<8x256xf32> to vector<8x239xf32>
    %187 = tpu.concatenate %185, %186 in 1 : vector<8x17xf32>, vector<8x239xf32> -> vector<8x256xf32>
    %cst_57 = arith.constant 0.000000e+00 : f32
    %188 = vector.shape_cast %18 : vector<1x256xi1> to vector<1x256xi1>
    %189 = vector.broadcast %188 : vector<1x256xi1> to vector<8x256xi1>
    %190 = vector.broadcast %cst_57 : f32 to vector<8x256xf32>
    %191 = arith.select %189, %187, %190 : vector<8x256xi1>, vector<8x256xf32>
    %cst_58 = arith.constant 0.000000e+00 : f32
    %192 = vector.broadcast %cst_58 : f32 to vector<8x16xf32>
    %193 = vector.extract_strided_slice %181 {offsets = [0, 0], sizes = [8, 240], strides = [1, 1]} : vector<8x256xf32> to vector<8x240xf32>
    %194 = tpu.concatenate %192, %193 in 1 : vector<8x16xf32>, vector<8x240xf32> -> vector<8x256xf32>
    %cst_59 = arith.constant 0.000000e+00 : f32
    %195 = vector.broadcast %cst_59 : f32 to vector<8x16xf32>
    %196 = vector.extract_strided_slice %182 {offsets = [0, 0], sizes = [8, 240], strides = [1, 1]} : vector<8x256xf32> to vector<8x240xf32>
    %197 = tpu.concatenate %195, %196 in 1 : vector<8x16xf32>, vector<8x240xf32> -> vector<8x256xf32>
    %cst_60 = arith.constant 0.000000e+00 : f32
    %198 = vector.broadcast %cst_60 : f32 to vector<8x1xf32>
    %199 = vector.extract_strided_slice %172 {offsets = [0, 0], sizes = [8, 255], strides = [1, 1]} : vector<8x256xf32> to vector<8x255xf32>
    %200 = tpu.concatenate %198, %199 in 1 : vector<8x1xf32>, vector<8x255xf32> -> vector<8x256xf32>
    %cst_61 = arith.constant 0.000000e+00 : f32
    %201 = vector.shape_cast %18 : vector<1x256xi1> to vector<1x256xi1>
    %202 = vector.broadcast %201 : vector<1x256xi1> to vector<8x256xi1>
    %203 = vector.broadcast %cst_61 : f32 to vector<8x256xf32>
    %204 = arith.select %202, %200, %203 : vector<8x256xi1>, vector<8x256xf32>
    %cst_62 = arith.constant 0.000000e+00 : f32
    %205 = vector.broadcast %cst_62 : f32 to vector<8x1xf32>
    %206 = vector.extract_strided_slice %176 {offsets = [0, 0], sizes = [8, 255], strides = [1, 1]} : vector<8x256xf32> to vector<8x255xf32>
    %207 = tpu.concatenate %205, %206 in 1 : vector<8x1xf32>, vector<8x255xf32> -> vector<8x256xf32>
    %cst_63 = arith.constant 0.000000e+00 : f32
    %208 = vector.shape_cast %18 : vector<1x256xi1> to vector<1x256xi1>
    %209 = vector.broadcast %208 : vector<1x256xi1> to vector<8x256xi1>
    %210 = vector.broadcast %cst_63 : f32 to vector<8x256xf32>
    %211 = arith.select %209, %207, %210 : vector<8x256xi1>, vector<8x256xf32>
    %212 = tpu.concatenate %191, %194, %197, %204, %169, %170, %211, %173, %174 in 0 : vector<8x256xf32>, vector<8x256xf32>, vector<8x256xf32>, vector<8x256xf32>, vector<8x256xf32>, vector<8x256xf32>, vector<8x256xf32>, vector<8x256xf32>, vector<8x256xf32> -> vector<72x256xf32>
    %cst_64 = arith.constant dense<0.000000e+00> : vector<3x256xf32>
    %213 = tpu.matmul %27, %212, %cst_64 {dimension_numbers = #tpu.dot_dimension_numbers<[1], [0], [0], [1], [0, 0, 1, 1], [], []>} : vector<3x72xf32>, vector<72x256xf32>, vector<3x256xf32> -> vector<3x256xf32>
    %214 = vector.broadcast %28 : vector<3x1xf32> to vector<3x256xf32>
    %215 = arith.addf %213, %214 : vector<3x256xf32>
    %cst_65 = arith.constant 0.000000e+00 : f32
    %216 = vector.broadcast %cst_65 : f32 to vector<8x16xf32>
    %217 = vector.extract_strided_slice %183 {offsets = [0, 0], sizes = [8, 240], strides = [1, 1]} : vector<8x256xf32> to vector<8x240xf32>
    %218 = tpu.concatenate %216, %217 in 1 : vector<8x16xf32>, vector<8x240xf32> -> vector<8x256xf32>
    %219 = tpu.concatenate %194, %197, %218, %169, %170, %171, %173, %174, %175 in 0 : vector<8x256xf32>, vector<8x256xf32>, vector<8x256xf32>, vector<8x256xf32>, vector<8x256xf32>, vector<8x256xf32>, vector<8x256xf32>, vector<8x256xf32>, vector<8x256xf32> -> vector<72x256xf32>
    %cst_66 = arith.constant dense<0.000000e+00> : vector<3x256xf32>
    %220 = tpu.matmul %27, %219, %cst_66 {dimension_numbers = #tpu.dot_dimension_numbers<[1], [0], [0], [1], [0, 0, 1, 1], [], []>} : vector<3x72xf32>, vector<72x256xf32>, vector<3x256xf32> -> vector<3x256xf32>
    %221 = vector.broadcast %28 : vector<3x1xf32> to vector<3x256xf32>
    %222 = arith.addf %220, %221 : vector<3x256xf32>
    %cst_67 = arith.constant 0.000000e+00 : f32
    %223 = vector.broadcast %cst_67 : f32 to vector<8x16xf32>
    %224 = vector.extract_strided_slice %184 {offsets = [0, 0], sizes = [8, 240], strides = [1, 1]} : vector<8x256xf32> to vector<8x240xf32>
    %225 = tpu.concatenate %223, %224 in 1 : vector<8x16xf32>, vector<8x240xf32> -> vector<8x256xf32>
    %226 = tpu.concatenate %197, %218, %225, %170, %171, %172, %174, %175, %176 in 0 : vector<8x256xf32>, vector<8x256xf32>, vector<8x256xf32>, vector<8x256xf32>, vector<8x256xf32>, vector<8x256xf32>, vector<8x256xf32>, vector<8x256xf32>, vector<8x256xf32> -> vector<72x256xf32>
    %cst_68 = arith.constant dense<0.000000e+00> : vector<3x256xf32>
    %227 = tpu.matmul %27, %226, %cst_68 {dimension_numbers = #tpu.dot_dimension_numbers<[1], [0], [0], [1], [0, 0, 1, 1], [], []>} : vector<3x72xf32>, vector<72x256xf32>, vector<3x256xf32> -> vector<3x256xf32>
    %228 = vector.broadcast %28 : vector<3x1xf32> to vector<3x256xf32>
    %229 = arith.addf %227, %228 : vector<3x256xf32>
    %cst_69 = arith.constant 0.000000e+00 : f32
    %230 = vector.broadcast %cst_69 : f32 to vector<8x15xf32>
    %231 = vector.extract_strided_slice %181 {offsets = [0, 0], sizes = [8, 241], strides = [1, 1]} : vector<8x256xf32> to vector<8x241xf32>
    %232 = tpu.concatenate %230, %231 in 1 : vector<8x15xf32>, vector<8x241xf32> -> vector<8x256xf32>
    %cst_70 = arith.constant 0.000000e+00 : f32
    %233 = vector.shape_cast %20 : vector<1x256xi1> to vector<1x256xi1>
    %234 = vector.broadcast %233 : vector<1x256xi1> to vector<8x256xi1>
    %235 = vector.broadcast %cst_70 : f32 to vector<8x256xf32>
    %236 = arith.select %234, %232, %235 : vector<8x256xi1>, vector<8x256xf32>
    %237 = vector.extract_strided_slice %169 {offsets = [0, 1], sizes = [8, 255], strides = [1, 1]} : vector<8x256xf32> to vector<8x255xf32>
    %cst_71 = arith.constant 0.000000e+00 : f32
    %238 = vector.broadcast %cst_71 : f32 to vector<8x1xf32>
    %239 = tpu.concatenate %237, %238 in 1 : vector<8x255xf32>, vector<8x1xf32> -> vector<8x256xf32>
    %cst_72 = arith.constant 0.000000e+00 : f32
    %240 = vector.shape_cast %20 : vector<1x256xi1> to vector<1x256xi1>
    %241 = vector.broadcast %240 : vector<1x256xi1> to vector<8x256xi1>
    %242 = vector.broadcast %cst_72 : f32 to vector<8x256xf32>
    %243 = arith.select %241, %239, %242 : vector<8x256xi1>, vector<8x256xf32>
    %244 = vector.extract_strided_slice %173 {offsets = [0, 1], sizes = [8, 255], strides = [1, 1]} : vector<8x256xf32> to vector<8x255xf32>
    %cst_73 = arith.constant 0.000000e+00 : f32
    %245 = vector.broadcast %cst_73 : f32 to vector<8x1xf32>
    %246 = tpu.concatenate %244, %245 in 1 : vector<8x255xf32>, vector<8x1xf32> -> vector<8x256xf32>
    %cst_74 = arith.constant 0.000000e+00 : f32
    %247 = vector.shape_cast %20 : vector<1x256xi1> to vector<1x256xi1>
    %248 = vector.broadcast %247 : vector<1x256xi1> to vector<8x256xi1>
    %249 = vector.broadcast %cst_74 : f32 to vector<8x256xf32>
    %250 = arith.select %248, %246, %249 : vector<8x256xi1>, vector<8x256xf32>
    %251 = tpu.concatenate %218, %225, %236, %171, %172, %243, %175, %176, %250 in 0 : vector<8x256xf32>, vector<8x256xf32>, vector<8x256xf32>, vector<8x256xf32>, vector<8x256xf32>, vector<8x256xf32>, vector<8x256xf32>, vector<8x256xf32>, vector<8x256xf32> -> vector<72x256xf32>
    %cst_75 = arith.constant dense<0.000000e+00> : vector<3x256xf32>
    %252 = tpu.matmul %27, %251, %cst_75 {dimension_numbers = #tpu.dot_dimension_numbers<[1], [0], [0], [1], [0, 0, 1, 1], [], []>} : vector<3x72xf32>, vector<72x256xf32>, vector<3x256xf32> -> vector<3x256xf32>
    %253 = vector.broadcast %28 : vector<3x1xf32> to vector<3x256xf32>
    %254 = arith.addf %252, %253 : vector<3x256xf32>
    %cst_76 = arith.constant 0.000000e+00 : f32
    %255 = vector.broadcast %cst_76 : f32 to vector<8x1xf32>
    %256 = vector.extract_strided_slice %180 {offsets = [0, 0], sizes = [8, 255], strides = [1, 1]} : vector<8x256xf32> to vector<8x255xf32>
    %257 = tpu.concatenate %255, %256 in 1 : vector<8x1xf32>, vector<8x255xf32> -> vector<8x256xf32>
    %cst_77 = arith.constant 0.000000e+00 : f32
    %258 = vector.shape_cast %18 : vector<1x256xi1> to vector<1x256xi1>
    %259 = vector.broadcast %258 : vector<1x256xi1> to vector<8x256xi1>
    %260 = vector.broadcast %cst_77 : f32 to vector<8x256xf32>
    %261 = arith.select %259, %257, %260 : vector<8x256xi1>, vector<8x256xf32>
    %262 = tpu.concatenate %204, %169, %170, %211, %173, %174, %261, %177, %178 in 0 : vector<8x256xf32>, vector<8x256xf32>, vector<8x256xf32>, vector<8x256xf32>, vector<8x256xf32>, vector<8x256xf32>, vector<8x256xf32>, vector<8x256xf32>, vector<8x256xf32> -> vector<72x256xf32>
    %cst_78 = arith.constant dense<0.000000e+00> : vector<3x256xf32>
    %263 = tpu.matmul %27, %262, %cst_78 {dimension_numbers = #tpu.dot_dimension_numbers<[1], [0], [0], [1], [0, 0, 1, 1], [], []>} : vector<3x72xf32>, vector<72x256xf32>, vector<3x256xf32> -> vector<3x256xf32>
    %264 = vector.broadcast %28 : vector<3x1xf32> to vector<3x256xf32>
    %265 = arith.addf %263, %264 : vector<3x256xf32>
    %266 = tpu.concatenate %169, %170, %171, %173, %174, %175, %177, %178, %179 in 0 : vector<8x256xf32>, vector<8x256xf32>, vector<8x256xf32>, vector<8x256xf32>, vector<8x256xf32>, vector<8x256xf32>, vector<8x256xf32>, vector<8x256xf32>, vector<8x256xf32> -> vector<72x256xf32>
    %cst_79 = arith.constant dense<0.000000e+00> : vector<3x256xf32>
    %267 = tpu.matmul %27, %266, %cst_79 {dimension_numbers = #tpu.dot_dimension_numbers<[1], [0], [0], [1], [0, 0, 1, 1], [], []>} : vector<3x72xf32>, vector<72x256xf32>, vector<3x256xf32> -> vector<3x256xf32>
    %268 = vector.broadcast %28 : vector<3x1xf32> to vector<3x256xf32>
    %269 = arith.addf %267, %268 : vector<3x256xf32>
    %270 = tpu.concatenate %170, %171, %172, %174, %175, %176, %178, %179, %180 in 0 : vector<8x256xf32>, vector<8x256xf32>, vector<8x256xf32>, vector<8x256xf32>, vector<8x256xf32>, vector<8x256xf32>, vector<8x256xf32>, vector<8x256xf32>, vector<8x256xf32> -> vector<72x256xf32>
    %cst_80 = arith.constant dense<0.000000e+00> : vector<3x256xf32>
    %271 = tpu.matmul %27, %270, %cst_80 {dimension_numbers = #tpu.dot_dimension_numbers<[1], [0], [0], [1], [0, 0, 1, 1], [], []>} : vector<3x72xf32>, vector<72x256xf32>, vector<3x256xf32> -> vector<3x256xf32>
    %272 = vector.broadcast %28 : vector<3x1xf32> to vector<3x256xf32>
    %273 = arith.addf %271, %272 : vector<3x256xf32>
    %274 = vector.extract_strided_slice %177 {offsets = [0, 1], sizes = [8, 255], strides = [1, 1]} : vector<8x256xf32> to vector<8x255xf32>
    %cst_81 = arith.constant 0.000000e+00 : f32
    %275 = vector.broadcast %cst_81 : f32 to vector<8x1xf32>
    %276 = tpu.concatenate %274, %275 in 1 : vector<8x255xf32>, vector<8x1xf32> -> vector<8x256xf32>
    %cst_82 = arith.constant 0.000000e+00 : f32
    %277 = vector.shape_cast %20 : vector<1x256xi1> to vector<1x256xi1>
    %278 = vector.broadcast %277 : vector<1x256xi1> to vector<8x256xi1>
    %279 = vector.broadcast %cst_82 : f32 to vector<8x256xf32>
    %280 = arith.select %278, %276, %279 : vector<8x256xi1>, vector<8x256xf32>
    %281 = tpu.concatenate %171, %172, %243, %175, %176, %250, %179, %180, %280 in 0 : vector<8x256xf32>, vector<8x256xf32>, vector<8x256xf32>, vector<8x256xf32>, vector<8x256xf32>, vector<8x256xf32>, vector<8x256xf32>, vector<8x256xf32>, vector<8x256xf32> -> vector<72x256xf32>
    %cst_83 = arith.constant dense<0.000000e+00> : vector<3x256xf32>
    %282 = tpu.matmul %27, %281, %cst_83 {dimension_numbers = #tpu.dot_dimension_numbers<[1], [0], [0], [1], [0, 0, 1, 1], [], []>} : vector<3x72xf32>, vector<72x256xf32>, vector<3x256xf32> -> vector<3x256xf32>
    %283 = vector.broadcast %28 : vector<3x1xf32> to vector<3x256xf32>
    %284 = arith.addf %282, %283 : vector<3x256xf32>
    %cst_84 = arith.constant 0.000000e+00 : f32
    %285 = vector.broadcast %cst_84 : f32 to vector<8x1xf32>
    %286 = vector.extract_strided_slice %184 {offsets = [0, 0], sizes = [8, 255], strides = [1, 1]} : vector<8x256xf32> to vector<8x255xf32>
    %287 = tpu.concatenate %285, %286 in 1 : vector<8x1xf32>, vector<8x255xf32> -> vector<8x256xf32>
    %cst_85 = arith.constant 0.000000e+00 : f32
    %288 = vector.shape_cast %18 : vector<1x256xi1> to vector<1x256xi1>
    %289 = vector.broadcast %288 : vector<1x256xi1> to vector<8x256xi1>
    %290 = vector.broadcast %cst_85 : f32 to vector<8x256xf32>
    %291 = arith.select %289, %287, %290 : vector<8x256xi1>, vector<8x256xf32>
    %292 = tpu.concatenate %211, %173, %174, %261, %177, %178, %291, %181, %182 in 0 : vector<8x256xf32>, vector<8x256xf32>, vector<8x256xf32>, vector<8x256xf32>, vector<8x256xf32>, vector<8x256xf32>, vector<8x256xf32>, vector<8x256xf32>, vector<8x256xf32> -> vector<72x256xf32>
    %cst_86 = arith.constant dense<0.000000e+00> : vector<3x256xf32>
    %293 = tpu.matmul %27, %292, %cst_86 {dimension_numbers = #tpu.dot_dimension_numbers<[1], [0], [0], [1], [0, 0, 1, 1], [], []>} : vector<3x72xf32>, vector<72x256xf32>, vector<3x256xf32> -> vector<3x256xf32>
    %294 = vector.broadcast %28 : vector<3x1xf32> to vector<3x256xf32>
    %295 = arith.addf %293, %294 : vector<3x256xf32>
    %296 = tpu.concatenate %173, %174, %175, %177, %178, %179, %181, %182, %183 in 0 : vector<8x256xf32>, vector<8x256xf32>, vector<8x256xf32>, vector<8x256xf32>, vector<8x256xf32>, vector<8x256xf32>, vector<8x256xf32>, vector<8x256xf32>, vector<8x256xf32> -> vector<72x256xf32>
    %cst_87 = arith.constant dense<0.000000e+00> : vector<3x256xf32>
    %297 = tpu.matmul %27, %296, %cst_87 {dimension_numbers = #tpu.dot_dimension_numbers<[1], [0], [0], [1], [0, 0, 1, 1], [], []>} : vector<3x72xf32>, vector<72x256xf32>, vector<3x256xf32> -> vector<3x256xf32>
    %298 = vector.broadcast %28 : vector<3x1xf32> to vector<3x256xf32>
    %299 = arith.addf %297, %298 : vector<3x256xf32>
    %300 = tpu.concatenate %174, %175, %176, %178, %179, %180, %182, %183, %184 in 0 : vector<8x256xf32>, vector<8x256xf32>, vector<8x256xf32>, vector<8x256xf32>, vector<8x256xf32>, vector<8x256xf32>, vector<8x256xf32>, vector<8x256xf32>, vector<8x256xf32> -> vector<72x256xf32>
    %cst_88 = arith.constant dense<0.000000e+00> : vector<3x256xf32>
    %301 = tpu.matmul %27, %300, %cst_88 {dimension_numbers = #tpu.dot_dimension_numbers<[1], [0], [0], [1], [0, 0, 1, 1], [], []>} : vector<3x72xf32>, vector<72x256xf32>, vector<3x256xf32> -> vector<3x256xf32>
    %302 = vector.broadcast %28 : vector<3x1xf32> to vector<3x256xf32>
    %303 = arith.addf %301, %302 : vector<3x256xf32>
    %304 = vector.extract_strided_slice %181 {offsets = [0, 1], sizes = [8, 255], strides = [1, 1]} : vector<8x256xf32> to vector<8x255xf32>
    %cst_89 = arith.constant 0.000000e+00 : f32
    %305 = vector.broadcast %cst_89 : f32 to vector<8x1xf32>
    %306 = tpu.concatenate %304, %305 in 1 : vector<8x255xf32>, vector<8x1xf32> -> vector<8x256xf32>
    %cst_90 = arith.constant 0.000000e+00 : f32
    %307 = vector.shape_cast %20 : vector<1x256xi1> to vector<1x256xi1>
    %308 = vector.broadcast %307 : vector<1x256xi1> to vector<8x256xi1>
    %309 = vector.broadcast %cst_90 : f32 to vector<8x256xf32>
    %310 = arith.select %308, %306, %309 : vector<8x256xi1>, vector<8x256xf32>
    %311 = tpu.concatenate %175, %176, %250, %179, %180, %280, %183, %184, %310 in 0 : vector<8x256xf32>, vector<8x256xf32>, vector<8x256xf32>, vector<8x256xf32>, vector<8x256xf32>, vector<8x256xf32>, vector<8x256xf32>, vector<8x256xf32>, vector<8x256xf32> -> vector<72x256xf32>
    %cst_91 = arith.constant dense<0.000000e+00> : vector<3x256xf32>
    %312 = tpu.matmul %27, %311, %cst_91 {dimension_numbers = #tpu.dot_dimension_numbers<[1], [0], [0], [1], [0, 0, 1, 1], [], []>} : vector<3x72xf32>, vector<72x256xf32>, vector<3x256xf32> -> vector<3x256xf32>
    %313 = vector.broadcast %28 : vector<3x1xf32> to vector<3x256xf32>
    %314 = arith.addf %312, %313 : vector<3x256xf32>
    %315 = vector.extract_strided_slice %172 {offsets = [0, 15], sizes = [8, 241], strides = [1, 1]} : vector<8x256xf32> to vector<8x241xf32>
    %cst_92 = arith.constant 0.000000e+00 : f32
    %316 = vector.broadcast %cst_92 : f32 to vector<8x15xf32>
    %317 = tpu.concatenate %315, %316 in 1 : vector<8x241xf32>, vector<8x15xf32> -> vector<8x256xf32>
    %cst_93 = arith.constant 0.000000e+00 : f32
    %318 = vector.shape_cast %18 : vector<1x256xi1> to vector<1x256xi1>
    %319 = vector.broadcast %318 : vector<1x256xi1> to vector<8x256xi1>
    %320 = vector.broadcast %cst_93 : f32 to vector<8x256xf32>
    %321 = arith.select %319, %317, %320 : vector<8x256xi1>, vector<8x256xf32>
    %322 = vector.extract_strided_slice %169 {offsets = [0, 16], sizes = [8, 240], strides = [1, 1]} : vector<8x256xf32> to vector<8x240xf32>
    %cst_94 = arith.constant 0.000000e+00 : f32
    %323 = vector.broadcast %cst_94 : f32 to vector<8x16xf32>
    %324 = tpu.concatenate %322, %323 in 1 : vector<8x240xf32>, vector<8x16xf32> -> vector<8x256xf32>
    %325 = vector.extract_strided_slice %170 {offsets = [0, 16], sizes = [8, 240], strides = [1, 1]} : vector<8x256xf32> to vector<8x240xf32>
    %cst_95 = arith.constant 0.000000e+00 : f32
    %326 = vector.broadcast %cst_95 : f32 to vector<8x16xf32>
    %327 = tpu.concatenate %325, %326 in 1 : vector<8x240xf32>, vector<8x16xf32> -> vector<8x256xf32>
    %328 = tpu.concatenate %261, %177, %178, %291, %181, %182, %321, %324, %327 in 0 : vector<8x256xf32>, vector<8x256xf32>, vector<8x256xf32>, vector<8x256xf32>, vector<8x256xf32>, vector<8x256xf32>, vector<8x256xf32>, vector<8x256xf32>, vector<8x256xf32> -> vector<72x256xf32>
    %cst_96 = arith.constant dense<0.000000e+00> : vector<3x256xf32>
    %329 = tpu.matmul %27, %328, %cst_96 {dimension_numbers = #tpu.dot_dimension_numbers<[1], [0], [0], [1], [0, 0, 1, 1], [], []>} : vector<3x72xf32>, vector<72x256xf32>, vector<3x256xf32> -> vector<3x256xf32>
    %330 = vector.broadcast %28 : vector<3x1xf32> to vector<3x256xf32>
    %331 = arith.addf %329, %330 : vector<3x256xf32>
    %332 = vector.extract_strided_slice %171 {offsets = [0, 16], sizes = [8, 240], strides = [1, 1]} : vector<8x256xf32> to vector<8x240xf32>
    %cst_97 = arith.constant 0.000000e+00 : f32
    %333 = vector.broadcast %cst_97 : f32 to vector<8x16xf32>
    %334 = tpu.concatenate %332, %333 in 1 : vector<8x240xf32>, vector<8x16xf32> -> vector<8x256xf32>
    %335 = tpu.concatenate %177, %178, %179, %181, %182, %183, %324, %327, %334 in 0 : vector<8x256xf32>, vector<8x256xf32>, vector<8x256xf32>, vector<8x256xf32>, vector<8x256xf32>, vector<8x256xf32>, vector<8x256xf32>, vector<8x256xf32>, vector<8x256xf32> -> vector<72x256xf32>
    %cst_98 = arith.constant dense<0.000000e+00> : vector<3x256xf32>
    %336 = tpu.matmul %27, %335, %cst_98 {dimension_numbers = #tpu.dot_dimension_numbers<[1], [0], [0], [1], [0, 0, 1, 1], [], []>} : vector<3x72xf32>, vector<72x256xf32>, vector<3x256xf32> -> vector<3x256xf32>
    %337 = vector.broadcast %28 : vector<3x1xf32> to vector<3x256xf32>
    %338 = arith.addf %336, %337 : vector<3x256xf32>
    %339 = vector.extract_strided_slice %172 {offsets = [0, 16], sizes = [8, 240], strides = [1, 1]} : vector<8x256xf32> to vector<8x240xf32>
    %cst_99 = arith.constant 0.000000e+00 : f32
    %340 = vector.broadcast %cst_99 : f32 to vector<8x16xf32>
    %341 = tpu.concatenate %339, %340 in 1 : vector<8x240xf32>, vector<8x16xf32> -> vector<8x256xf32>
    %342 = tpu.concatenate %178, %179, %180, %182, %183, %184, %327, %334, %341 in 0 : vector<8x256xf32>, vector<8x256xf32>, vector<8x256xf32>, vector<8x256xf32>, vector<8x256xf32>, vector<8x256xf32>, vector<8x256xf32>, vector<8x256xf32>, vector<8x256xf32> -> vector<72x256xf32>
    %cst_100 = arith.constant dense<0.000000e+00> : vector<3x256xf32>
    %343 = tpu.matmul %27, %342, %cst_100 {dimension_numbers = #tpu.dot_dimension_numbers<[1], [0], [0], [1], [0, 0, 1, 1], [], []>} : vector<3x72xf32>, vector<72x256xf32>, vector<3x256xf32> -> vector<3x256xf32>
    %344 = vector.broadcast %28 : vector<3x1xf32> to vector<3x256xf32>
    %345 = arith.addf %343, %344 : vector<3x256xf32>
    %346 = vector.extract_strided_slice %169 {offsets = [0, 17], sizes = [8, 239], strides = [1, 1]} : vector<8x256xf32> to vector<8x239xf32>
    %cst_101 = arith.constant 0.000000e+00 : f32
    %347 = vector.broadcast %cst_101 : f32 to vector<8x17xf32>
    %348 = tpu.concatenate %346, %347 in 1 : vector<8x239xf32>, vector<8x17xf32> -> vector<8x256xf32>
    %cst_102 = arith.constant 0.000000e+00 : f32
    %349 = vector.shape_cast %20 : vector<1x256xi1> to vector<1x256xi1>
    %350 = vector.broadcast %349 : vector<1x256xi1> to vector<8x256xi1>
    %351 = vector.broadcast %cst_102 : f32 to vector<8x256xf32>
    %352 = arith.select %350, %348, %351 : vector<8x256xi1>, vector<8x256xf32>
    %353 = tpu.concatenate %179, %180, %280, %183, %184, %310, %334, %341, %352 in 0 : vector<8x256xf32>, vector<8x256xf32>, vector<8x256xf32>, vector<8x256xf32>, vector<8x256xf32>, vector<8x256xf32>, vector<8x256xf32>, vector<8x256xf32>, vector<8x256xf32> -> vector<72x256xf32>
    %cst_103 = arith.constant dense<0.000000e+00> : vector<3x256xf32>
    %354 = tpu.matmul %27, %353, %cst_103 {dimension_numbers = #tpu.dot_dimension_numbers<[1], [0], [0], [1], [0, 0, 1, 1], [], []>} : vector<3x72xf32>, vector<72x256xf32>, vector<3x256xf32> -> vector<3x256xf32>
    %355 = vector.broadcast %28 : vector<3x1xf32> to vector<3x256xf32>
    %356 = arith.addf %354, %355 : vector<3x256xf32>
    %c0_104 = arith.constant 0 : index
    %c0_105 = arith.constant 0 : index
    %c0_106 = arith.constant 0 : index
    %c0_107 = arith.constant 0 : index
    %357 = vector.load %arg8[%c0_104, %c0_105, %c0_106, %c0_107] : memref<1x16x3x256xf32, #tpu.memory_space<vmem>>, vector<1x1x3x256xf32>
    %358 = vector.shape_cast %357 : vector<1x1x3x256xf32> to vector<3x256xf32>
    %359 = vector.shape_cast %215 : vector<3x256xf32> to vector<1x1x3x256xf32>
    tpu.vector_store %arg8[%c0_104, %c0_105, %c0_106, %c0_107], %359 {strides = array<i32>} : memref<1x16x3x256xf32, #tpu.memory_space<vmem>>, vector<1x1x3x256xf32>,
    %c0_108 = arith.constant 0 : index
    %c1 = arith.constant 1 : index
    %c0_109 = arith.constant 0 : index
    %c0_110 = arith.constant 0 : index
    %360 = vector.load %arg8[%c0_108, %c1, %c0_109, %c0_110] : memref<1x16x3x256xf32, #tpu.memory_space<vmem>>, vector<1x1x3x256xf32>
    %361 = vector.shape_cast %360 : vector<1x1x3x256xf32> to vector<3x256xf32>
    %362 = vector.shape_cast %222 : vector<3x256xf32> to vector<1x1x3x256xf32>
    tpu.vector_store %arg8[%c0_108, %c1, %c0_109, %c0_110], %362 {strides = array<i32>} : memref<1x16x3x256xf32, #tpu.memory_space<vmem>>, vector<1x1x3x256xf32>,
    %c0_111 = arith.constant 0 : index
    %c2 = arith.constant 2 : index
    %c0_112 = arith.constant 0 : index
    %c0_113 = arith.constant 0 : index
    %363 = vector.load %arg8[%c0_111, %c2, %c0_112, %c0_113] : memref<1x16x3x256xf32, #tpu.memory_space<vmem>>, vector<1x1x3x256xf32>
    %364 = vector.shape_cast %363 : vector<1x1x3x256xf32> to vector<3x256xf32>
    %365 = vector.shape_cast %229 : vector<3x256xf32> to vector<1x1x3x256xf32>
    tpu.vector_store %arg8[%c0_111, %c2, %c0_112, %c0_113], %365 {strides = array<i32>} : memref<1x16x3x256xf32, #tpu.memory_space<vmem>>, vector<1x1x3x256xf32>,
    %c0_114 = arith.constant 0 : index
    %c3 = arith.constant 3 : index
    %c0_115 = arith.constant 0 : index
    %c0_116 = arith.constant 0 : index
    %366 = vector.load %arg8[%c0_114, %c3, %c0_115, %c0_116] : memref<1x16x3x256xf32, #tpu.memory_space<vmem>>, vector<1x1x3x256xf32>
    %367 = vector.shape_cast %366 : vector<1x1x3x256xf32> to vector<3x256xf32>
    %368 = vector.shape_cast %254 : vector<3x256xf32> to vector<1x1x3x256xf32>
    tpu.vector_store %arg8[%c0_114, %c3, %c0_115, %c0_116], %368 {strides = array<i32>} : memref<1x16x3x256xf32, #tpu.memory_space<vmem>>, vector<1x1x3x256xf32>,
    %c0_117 = arith.constant 0 : index
    %c4 = arith.constant 4 : index
    %c0_118 = arith.constant 0 : index
    %c0_119 = arith.constant 0 : index
    %369 = vector.load %arg8[%c0_117, %c4, %c0_118, %c0_119] : memref<1x16x3x256xf32, #tpu.memory_space<vmem>>, vector<1x1x3x256xf32>
    %370 = vector.shape_cast %369 : vector<1x1x3x256xf32> to vector<3x256xf32>
    %371 = vector.shape_cast %265 : vector<3x256xf32> to vector<1x1x3x256xf32>
    tpu.vector_store %arg8[%c0_117, %c4, %c0_118, %c0_119], %371 {strides = array<i32>} : memref<1x16x3x256xf32, #tpu.memory_space<vmem>>, vector<1x1x3x256xf32>,
    %c0_120 = arith.constant 0 : index
    %c5 = arith.constant 5 : index
    %c0_121 = arith.constant 0 : index
    %c0_122 = arith.constant 0 : index
    %372 = vector.load %arg8[%c0_120, %c5, %c0_121, %c0_122] : memref<1x16x3x256xf32, #tpu.memory_space<vmem>>, vector<1x1x3x256xf32>
    %373 = vector.shape_cast %372 : vector<1x1x3x256xf32> to vector<3x256xf32>
    %374 = vector.shape_cast %269 : vector<3x256xf32> to vector<1x1x3x256xf32>
    tpu.vector_store %arg8[%c0_120, %c5, %c0_121, %c0_122], %374 {strides = array<i32>} : memref<1x16x3x256xf32, #tpu.memory_space<vmem>>, vector<1x1x3x256xf32>,
    %c0_123 = arith.constant 0 : index
    %c6 = arith.constant 6 : index
    %c0_124 = arith.constant 0 : index
    %c0_125 = arith.constant 0 : index
    %375 = vector.load %arg8[%c0_123, %c6, %c0_124, %c0_125] : memref<1x16x3x256xf32, #tpu.memory_space<vmem>>, vector<1x1x3x256xf32>
    %376 = vector.shape_cast %375 : vector<1x1x3x256xf32> to vector<3x256xf32>
    %377 = vector.shape_cast %273 : vector<3x256xf32> to vector<1x1x3x256xf32>
    tpu.vector_store %arg8[%c0_123, %c6, %c0_124, %c0_125], %377 {strides = array<i32>} : memref<1x16x3x256xf32, #tpu.memory_space<vmem>>, vector<1x1x3x256xf32>,
    %c0_126 = arith.constant 0 : index
    %c7 = arith.constant 7 : index
    %c0_127 = arith.constant 0 : index
    %c0_128 = arith.constant 0 : index
    %378 = vector.load %arg8[%c0_126, %c7, %c0_127, %c0_128] : memref<1x16x3x256xf32, #tpu.memory_space<vmem>>, vector<1x1x3x256xf32>
    %379 = vector.shape_cast %378 : vector<1x1x3x256xf32> to vector<3x256xf32>
    %380 = vector.shape_cast %284 : vector<3x256xf32> to vector<1x1x3x256xf32>
    tpu.vector_store %arg8[%c0_126, %c7, %c0_127, %c0_128], %380 {strides = array<i32>} : memref<1x16x3x256xf32, #tpu.memory_space<vmem>>, vector<1x1x3x256xf32>,
    %c0_129 = arith.constant 0 : index
    %c8 = arith.constant 8 : index
    %c0_130 = arith.constant 0 : index
    %c0_131 = arith.constant 0 : index
    %381 = vector.load %arg8[%c0_129, %c8, %c0_130, %c0_131] : memref<1x16x3x256xf32, #tpu.memory_space<vmem>>, vector<1x1x3x256xf32>
    %382 = vector.shape_cast %381 : vector<1x1x3x256xf32> to vector<3x256xf32>
    %383 = vector.shape_cast %295 : vector<3x256xf32> to vector<1x1x3x256xf32>
    tpu.vector_store %arg8[%c0_129, %c8, %c0_130, %c0_131], %383 {strides = array<i32>} : memref<1x16x3x256xf32, #tpu.memory_space<vmem>>, vector<1x1x3x256xf32>,
    %c0_132 = arith.constant 0 : index
    %c9 = arith.constant 9 : index
    %c0_133 = arith.constant 0 : index
    %c0_134 = arith.constant 0 : index
    %384 = vector.load %arg8[%c0_132, %c9, %c0_133, %c0_134] : memref<1x16x3x256xf32, #tpu.memory_space<vmem>>, vector<1x1x3x256xf32>
    %385 = vector.shape_cast %384 : vector<1x1x3x256xf32> to vector<3x256xf32>
    %386 = vector.shape_cast %299 : vector<3x256xf32> to vector<1x1x3x256xf32>
    tpu.vector_store %arg8[%c0_132, %c9, %c0_133, %c0_134], %386 {strides = array<i32>} : memref<1x16x3x256xf32, #tpu.memory_space<vmem>>, vector<1x1x3x256xf32>,
    %c0_135 = arith.constant 0 : index
    %c10 = arith.constant 10 : index
    %c0_136 = arith.constant 0 : index
    %c0_137 = arith.constant 0 : index
    %387 = vector.load %arg8[%c0_135, %c10, %c0_136, %c0_137] : memref<1x16x3x256xf32, #tpu.memory_space<vmem>>, vector<1x1x3x256xf32>
    %388 = vector.shape_cast %387 : vector<1x1x3x256xf32> to vector<3x256xf32>
    %389 = vector.shape_cast %303 : vector<3x256xf32> to vector<1x1x3x256xf32>
    tpu.vector_store %arg8[%c0_135, %c10, %c0_136, %c0_137], %389 {strides = array<i32>} : memref<1x16x3x256xf32, #tpu.memory_space<vmem>>, vector<1x1x3x256xf32>,
    %c0_138 = arith.constant 0 : index
    %c11 = arith.constant 11 : index
    %c0_139 = arith.constant 0 : index
    %c0_140 = arith.constant 0 : index
    %390 = vector.load %arg8[%c0_138, %c11, %c0_139, %c0_140] : memref<1x16x3x256xf32, #tpu.memory_space<vmem>>, vector<1x1x3x256xf32>
    %391 = vector.shape_cast %390 : vector<1x1x3x256xf32> to vector<3x256xf32>
    %392 = vector.shape_cast %314 : vector<3x256xf32> to vector<1x1x3x256xf32>
    tpu.vector_store %arg8[%c0_138, %c11, %c0_139, %c0_140], %392 {strides = array<i32>} : memref<1x16x3x256xf32, #tpu.memory_space<vmem>>, vector<1x1x3x256xf32>,
    %c0_141 = arith.constant 0 : index
    %c12 = arith.constant 12 : index
    %c0_142 = arith.constant 0 : index
    %c0_143 = arith.constant 0 : index
    %393 = vector.load %arg8[%c0_141, %c12, %c0_142, %c0_143] : memref<1x16x3x256xf32, #tpu.memory_space<vmem>>, vector<1x1x3x256xf32>
    %394 = vector.shape_cast %393 : vector<1x1x3x256xf32> to vector<3x256xf32>
    %395 = vector.shape_cast %331 : vector<3x256xf32> to vector<1x1x3x256xf32>
    tpu.vector_store %arg8[%c0_141, %c12, %c0_142, %c0_143], %395 {strides = array<i32>} : memref<1x16x3x256xf32, #tpu.memory_space<vmem>>, vector<1x1x3x256xf32>,
    %c0_144 = arith.constant 0 : index
    %c13 = arith.constant 13 : index
    %c0_145 = arith.constant 0 : index
    %c0_146 = arith.constant 0 : index
    %396 = vector.load %arg8[%c0_144, %c13, %c0_145, %c0_146] : memref<1x16x3x256xf32, #tpu.memory_space<vmem>>, vector<1x1x3x256xf32>
    %397 = vector.shape_cast %396 : vector<1x1x3x256xf32> to vector<3x256xf32>
    %398 = vector.shape_cast %338 : vector<3x256xf32> to vector<1x1x3x256xf32>
    tpu.vector_store %arg8[%c0_144, %c13, %c0_145, %c0_146], %398 {strides = array<i32>} : memref<1x16x3x256xf32, #tpu.memory_space<vmem>>, vector<1x1x3x256xf32>,
    %c0_147 = arith.constant 0 : index
    %c14 = arith.constant 14 : index
    %c0_148 = arith.constant 0 : index
    %c0_149 = arith.constant 0 : index
    %399 = vector.load %arg8[%c0_147, %c14, %c0_148, %c0_149] : memref<1x16x3x256xf32, #tpu.memory_space<vmem>>, vector<1x1x3x256xf32>
    %400 = vector.shape_cast %399 : vector<1x1x3x256xf32> to vector<3x256xf32>
    %401 = vector.shape_cast %345 : vector<3x256xf32> to vector<1x1x3x256xf32>
    tpu.vector_store %arg8[%c0_147, %c14, %c0_148, %c0_149], %401 {strides = array<i32>} : memref<1x16x3x256xf32, #tpu.memory_space<vmem>>, vector<1x1x3x256xf32>,
    %c0_150 = arith.constant 0 : index
    %c15 = arith.constant 15 : index
    %c0_151 = arith.constant 0 : index
    %c0_152 = arith.constant 0 : index
    %402 = vector.load %arg8[%c0_150, %c15, %c0_151, %c0_152] : memref<1x16x3x256xf32, #tpu.memory_space<vmem>>, vector<1x1x3x256xf32>
    %403 = vector.shape_cast %402 : vector<1x1x3x256xf32> to vector<3x256xf32>
    %404 = vector.shape_cast %356 : vector<3x256xf32> to vector<1x1x3x256xf32>
    tpu.vector_store %arg8[%c0_150, %c15, %c0_151, %c0_152], %404 {strides = array<i32>} : memref<1x16x3x256xf32, #tpu.memory_space<vmem>>, vector<1x1x3x256xf32>,
    return
  }
  func.func @transform_0(%arg0: i32) -> (i32, i32, i32) {
    %c0_i32 = arith.constant 0 : i32
    %c0_i32_0 = arith.constant 0 : i32
    %c0_i32_1 = arith.constant 0 : i32
    return %arg0, %c0_i32, %c0_i32_0 : i32, i32, i32
  }
  func.func @transform_1(%arg0: i32) -> (i32, i32) {
    %c0_i32 = arith.constant 0 : i32
    %c0_i32_0 = arith.constant 0 : i32
    %c0_i32_1 = arith.constant 0 : i32
    return %c0_i32, %c0_i32_0 : i32, i32
  }
  func.func @transform_2(%arg0: i32) -> (i32, i32) {
    %c0_i32 = arith.constant 0 : i32
    %c0_i32_0 = arith.constant 0 : i32
    %c0_i32_1 = arith.constant 0 : i32
    return %c0_i32, %c0_i32_0 : i32, i32
  }
  func.func @transform_3(%arg0: i32) -> (i32, i32) {
    %c0_i32 = arith.constant 0 : i32
    %c0_i32_0 = arith.constant 0 : i32
    %c0_i32_1 = arith.constant 0 : i32
    return %c0_i32, %c0_i32_0 : i32, i32
  }
  func.func @transform_4(%arg0: i32) -> (i32, i32) {
    %c0_i32 = arith.constant 0 : i32
    %c0_i32_0 = arith.constant 0 : i32
    %c0_i32_1 = arith.constant 0 : i32
    return %c0_i32, %c0_i32_0 : i32, i32
  }
  func.func @transform_5(%arg0: i32) -> (i32, i32) {
    %c0_i32 = arith.constant 0 : i32
    %c0_i32_0 = arith.constant 0 : i32
    %c0_i32_1 = arith.constant 0 : i32
    return %c0_i32, %c0_i32_0 : i32, i32
  }
  func.func @transform_6(%arg0: i32) -> (i32, i32) {
    %c0_i32 = arith.constant 0 : i32
    %c0_i32_0 = arith.constant 0 : i32
    %c0_i32_1 = arith.constant 0 : i32
    return %c0_i32, %c0_i32_0 : i32, i32
  }
  func.func @transform_7(%arg0: i32) -> (i32, i32, i32, i32) {
    %c0_i32 = arith.constant 0 : i32
    %c0_i32_0 = arith.constant 0 : i32
    %c0_i32_1 = arith.constant 0 : i32
    %c0_i32_2 = arith.constant 0 : i32
    return %arg0, %c0_i32, %c0_i32_0, %c0_i32_1 : i32, i32, i32, i32
  }
}

</mosaic_0001>

<bundles_post_ra>
// kernel: upnet_forward.1
= control target key start
LH: loop header
LB: loop body
LE: loop exit
PB: predicated region body
PF: predicated region fallthrough
CT: control target
= control target key end

     0   :  { %s3388_s24 = smov 0   ;;  %s4599_s0 = inlined_call_operand.vmem [shape: f32[2,8,256], index: 0, kind: input, shape index: {}]   ;;  %s4600_s1 = inlined_call_operand.vmem [shape: f32[32,72], index: 1, kind: input, shape index: {}]   ;;  %s4601_s2 = inlined_call_operand.vmem [shape: f32[32,1], index: 2, kind: input, shape index: {}]   ;;  %s4602_s3 = inlined_call_operand.vmem [shape: f32[32,72], index: 3, kind: input, shape index: {}]   ;;  %s4603_s4 = inlined_call_operand.vmem [shape: f32[32,1], index: 4, kind: input, shape index: {}]   ;;  %s4604_s5 = inlined_call_operand.vmem [shape: f32[3,72], index: 5, kind: input, shape index: {}]   ;;  %s4605_s6 = inlined_call_operand.vmem [shape: f32[3,1], index: 6, kind: input, shape index: {}]   ;;  %s4606_s7 = inlined_call_operand.vmem [shape: f32[2,16,3,256], index: 7, kind: output, shape index: {}]  }
   0x1 LB: > { %s2556_s25 = sadd.s32 4294967295, %s3335_s24   ;;  %p2560_p0 = scmp.ge.s32.totalorder %s3335_s24, 1  ;;  %s3335_s24 = sphi %s3388_s24, %s17_s24  }
   0x2   : > { %p237_p1 = scmp.lt.s32.totalorder %s3335_s24, 3 }
   0x4   : > { %p238_p2 = pnand %p2560_p0, %p237_p1 }
   0x6   : > { %241 = sbr.rel (%p238_p2) target bundleno = 1269 (0x4f5), region = 48 }
   0xd   : > { %p269_p3 = scmp.lt.s32.totalorder %s2556_s25, 1  ;;  %s3337_s30 = smov 15   ;;  %v4629_v4 = vmov 0.0   ;;  %v318_v5 = vld [vmem:[%s4601_s2 + $0x10] sm:$0xff]  ;;  %v3346_v6 = vmov 0   ;;  %v319_v7 = vld [vmem:[%s4601_s2 + $0x18] sm:$0xff]  ;;  %v279_v10 = vlaneseq }
   0xe   : > { %s3338_s8 = smov 17   ;;  %s3339_s9 = smov 1   ;;  %521 = vmatprep.mubr.f32.mxu0 %v4629_v4  ;;  %694 = vmatprep.mubr.f32.mxu1 %v4629_v4  ;;  %v317_v8 = vld [vmem:[%s4601_s2 + $0x8] sm:$0xff]  ;;  %v316_v9 = vld [vmem:[%s4601_s2] sm:$0xff]  ;;  %vm4607_vm0 = vcmask 121856   ;;  %vm4613_vm1 = vcmask 138240  }
   0xf   : > { %s4815_s25 = smov (!%p269_p3, %s2556_s25), 1  ;;  %s3340_s10 = smov 16   ;;  %3217 = vset.pattern.permute.xlu1 %v3346_v6  ;;  %3218 = vset.pattern.permute.xlu0 %v3346_v6  ;;  %v280_v11 = vand.u32 127, %v279_v10  ;;  %vm4609_vm2 = vcmask 7168   ;;  %vm4615_vm4 = vcmask 130048   ;;  %v4662_v29 = vmov 0 }
  0x10   : > { %s2747_s26 = sshll.u32 %s4815_s25, 4  ;;  %s3341_s11 = smov 127   ;;  %vm3444_vm6 = vmneg %vm4615_vm4  ;;  %vm4616_vm8 = vmmov 1   ;;  %v4668_v38 = vmov 0  ;;  %v4670_v39 = vmov 0  ;;  %vm4608_vm12 = vcmask 1039360  }
  0x11   : > { %s273_s29 = scalar_lea.vmem %s4599_s0, %s2747_s26  ;;  %s3342_s12 = smov 113   ;;  %v281_v12 = vadd.s32 128, %v280_v11  ;;  %v286_v16 = vand.u32 15, %v280_v11  ;;  %v4663_v29 = vsel %vm3444_vm6, 4294967295, %v4662_v29  ;;  %vm4610_vm14 = vcmask 924672   ;;  %v314_v10 = vld [vmem:[%s4600_s1 + $0x10] sm:$0xff] }
  0x12   : > { %v3402_v0 = vld [vmem:[%s273_s29] sm:$0xff]  ;;  %v3404_v1 = vld [vmem:[%s273_s29 + $0x8] sm:$0xff]  ;;  %s3343_s13 = smov 112   ;;  %s3344_s14 = smov 111   ;;  %v315_v11 = vld [vmem:[%s4600_s1 + $0x18] sm:$0xff] }
  0x13   : > { %v3192_v2 = vpack.i.bf16 %v3404_v1, %v3402_v0  ;;  %v3202_v3 = vpack.i.bf16 %v3402_v0, %v3404_v1  ;;  %v293_v15 = vand.u32 15, %v281_v12  ;;  %vm3439_vm5 = vcmp.gt.s32.totalorder %v286_v16, 0 }
  0x14   : > { %vm3464_vm10 = vcmp.lt.s32.totalorder %v286_v16, 15  ;;  %vm3472_vm11 = vmpackc.low %vm3444_vm6, %vm3439_vm5 }
  0x15   : > { %3193 = vrot.lane.b32.xlu1 %v3192_v2, %s3337_s30  ;;  %3183 = vrot.lane.b32.xlu0 %v3192_v2, %s3338_s8  ;;  %vm3435_vm3 = vcmp.gt.s32.totalorder %v293_v15, 0  ;;  %vm3448_vm7 = vcmp.lt.s32.totalorder %v293_v15, 15  ;;  %v4669_v38 = vsel %vm3464_vm10, 4294967295, %v4668_v38  ;;  %v4671_v39 = vsel %vm3472_vm11, 4294967295, %v4670_v39  ;;  %vm2759_vm15 = vmpackc.low %vm3439_vm5, %vm3464_vm10 }
  0x16   : > { %vm3459_vm9 = vmpackc.low %vm4616_vm8, %vm3435_vm3 }
  0x17   : > { %vm2756_vm13 = vmpackc.low %vm3435_vm3, %vm3448_vm7 }
  0x19   : > { %3198 = vrot.lane.b32.xlu1 %v3192_v2, %s3339_s9  ;;  %3188 = vrot.lane.b32.xlu0 %v3192_v2, %s3340_s10 }
  0x1d   : > { %3203 = vrot.lane.b32.xlu0 %v3202_v3, %s3341_s11  ;;  %3208 = vrot.lane.b32.xlu1 %v3202_v3, %s3342_s12 }
  0x21   : > { %3213 = vrot.lane.b32.xlu0 %v3192_v2, %s3343_s13  ;;  %415 = vrot.lane.b32.xlu1 %v3404_v1, %s3344_s14 }
  0x25   : > { %413 = vrot.lane.b32.xlu0 %v3402_v0, %s3344_s14  ;;  %436 = vperm.xlu1 %3217, %v318_v5  }
  0x29   : > { %441 = vperm.xlu0 %3218, %v319_v7   ;;  %431 = vperm.xlu1 %3217, %v317_v8   ;;  %v312_v8 = vld [vmem:[%s4600_s1] sm:$0xff] }
  0x2d   : > { %426 = vperm.xlu1 %3217, %v316_v9   ;;  %v313_v9 = vld [vmem:[%s4600_s1 + $0x8] sm:$0xff] }
  0x87   : > { %v3194_v13 = vpop.permute.xlu1 %3193  ;;  %v3184_v14 = vpop.permute.xlu0 %3183 }
  0x88   : > { %v3196_v17 = vunpack.i.h.bf16 %v3194_v13  ;;  %v3195_v18 = vunpack.i.l.bf16 %v3194_v13  ;;  %v3186_v19 = vunpack.i.h.bf16 %v3184_v14  ;;  %v3185_v20 = vunpack.i.l.bf16 %v3184_v14 }
  0x8a   : > { %v361_v31 = vsel %vm4607_vm0, %v3195_v18, %v3196_v17  ;;  %v337_v33 = vsel %vm4613_vm1, %v3185_v20, %v3186_v19  ;;  %v340_v36 = vsel %vm4613_vm1, 0.0, %v3185_v20  ;;  %v364_v46 = vsel %vm4607_vm0, 0.0, %v3195_v18 }
  0x8b   : > { %v3199_v21 = vpop.permute.xlu1 %3198  ;;  %v3189_v22 = vpop.permute.xlu0 %3188  ;;  %vm4611_vm0 = vcmask 916480  }
  0x8c   : > { %v3201_v25 = vunpack.i.h.bf16 %v3199_v21  ;;  %v3200_v26 = vunpack.i.l.bf16 %v3199_v21  ;;  %v3191_v27 = vunpack.i.h.bf16 %v3189_v22  ;;  %v3190_v28 = vunpack.i.l.bf16 %v3189_v22 }
  0x8e   : > { %v376_v32 = vsel %vm4609_vm2, %v3200_v26, %v3201_v25  ;;  %v352_v34 = vsel %vm4615_vm4, %v3190_v28, %v3191_v27  ;;  %v2752_v42 = vpack.c.bf16 %v3190_v28, %v340_v36  ;;  %v379_v47 = vsel %vm4609_vm2, 0.0, %v3200_v26  ;;  %vm3516_vm2 = vmpackc.low %vm4611_vm0, %vm3435_vm3 }
  0x8f   : > { %v2749_v37 = vpack.c.bf16 %v352_v34, %v337_v33  ;;  %v3204_v40 = vpop.permute.xlu0 %3203  ;;  %v3209_v41 = vpop.permute.xlu1 %3208  ;;  %v2755_v48 = vpack.c.bf16 %v376_v32, %v361_v31  ;;  %v2758_v54 = vpack.c.bf16 %v379_v47, %v364_v46  ;;  %v325_v46 = vld [vmem:[%s4603_s4 + $0x8] sm:$0xff]  ;;  %v327_v47 = vld [vmem:[%s4603_s4 + $0x18] sm:$0xff] }
  0x90   : > { %v3206_v43 = vunpack.i.h.bf16 %v3204_v40  ;;  %v3205_v44 = vunpack.i.l.bf16 %v3204_v40  ;;  %v3210_v45 = vunpack.i.l.bf16 %v3209_v41  ;;  %v3211_v52 = vunpack.i.h.bf16 %v3209_v41 }
  0x91   : > { %2751 = vmatprep.subr.msk.bf16.mxu0 %vm3459_vm9, %v2749_v37 }
  0x92   : > { %2754 = vmatpush1.bf16.msk.msra.mxu0 %vm3472_vm11, %v2752_v42  ;;  %v390_v49 = vsel %vm4608_vm12, %v3205_v44, 0.0  ;;  %v387_v50 = vsel %vm4608_vm12, %v3206_v43, %v3205_v44  ;;  %v401_v55 = vsel %vm4610_vm14, %v3210_v45, 0.0  ;;  %vm3497_vm12 = vmpackc.low %vm3448_vm7, %vm4616_vm8  ;;  %v398_v60 = vsel %vm4610_vm14, %v3211_v52, %v3210_v45  ;;  %v326_v45 = vld [vmem:[%s4603_s4 + $0x10] sm:$0xff] }
  0x93   : > { %v2761_v51 = vpack.c.bf16 %v390_v49, %v3404_v1  ;;  %2757 = vmatprep.subr.msk.bf16.mxu0 %vm2756_vm13, %v2755_v48  ;;  %v3214_v53 = vpop.permute.xlu0 %3213  ;;  %v2764_v59 = vpack.c.bf16 %v387_v50, %v3402_v0  ;;  %vm3509_vm13 = vmpackc.low %vm3464_vm10, %vm4616_vm8  ;;  %v4676_v0 = vmov 0  ;;  %v416_v1 = vpop.permute.xlu1 %415  ;;  %v324_v48 = vld [vmem:[%s4603_s4] sm:$0xff] }
  0x94   : > { %v3216_v56 = vunpack.i.h.bf16 %v3214_v53  ;;  %v3215_v57 = vunpack.i.l.bf16 %v3214_v53  ;;  %v4677_v0 = vsel %vm3516_vm2, 4294967295, %v4676_v0  ;;  %vm3525_vm14 = vmpackc.low %vm4616_vm8, %vm3439_vm5 }
  0x95   : > { %4678 = vst [vmem:[#allocation2_spill] sm:$0xff] %v4677_v0 }
  0x96   : > { %2760 = vmatpush1.bf16.msk.msra.mxu0 %vm2759_vm15, %v2758_v54  ;;  %v2767_v61 = vpack.c.bf16 %v3216_v56, %v401_v55  ;;  %v409_v62 = vsel %vm4611_vm0, %v3215_v57, %v3216_v56  ;;  %vm4612_vm15 = vcmask 908288   ;;  %vm4614_vm0 = vcmask 588800  }
  0x97   : > { %2763 = vmatprep.subr.msk.bf16.mxu0 %vm3497_vm12, %v2761_v51  ;;  %v2770_v2 = vpack.c.bf16 %v409_v62, %v398_v60  ;;  %v421_v5 = vsel %vm4612_vm15, %v416_v1, 0.0  ;;  %v414_v6 = vpop.permute.xlu0 %413 }
  0x98   : > { %v418_v7 = vsel %vm4612_vm15, %v414_v6, %v416_v1  ;;  %vm4681_vm15 = vcmask 7168  }
  0x9a   : > { %2766 = vmatpush1.bf16.msk.msra.mxu0 %vm3509_vm13, %v2764_v59 }
  0x9b   : > { %2769 = vmatprep.subr.msk.bf16.mxu0 %vm3516_vm2, %v2767_v61 }
  0x9e   : > { %2772 = vmatpush1.bf16.msk.msra.mxu0 %vm3525_vm14, %v2770_v2 }
  0x9f   : > { %2578 = vmatprep.subr.msk.mxu0 %vm3448_vm7, %v421_v5 }
  0xa2   : > { %2579 = vmatpush1.msk.msra.mxu0 %vm3464_vm10, %v418_v7 }
  0xa3   : > { %2580 = vmatmul.mubr.msk.f32.vlgmr.msra.gmra.mrb[0].mxu0 %vm4614_vm0, %v312_v8 }
  0xa4   : > { %527 = vmatprep.mubr.f32.mxu0 %v4629_v4  ;;  %v437_v13 = vpop.permute.xlu1 %436 }
  0xa7   : > { %2581 = vmatmul.mubr.msk.f32.gmra.mrb[2].mxu0 %vm4614_vm0, %v313_v9 }
  0xa8   : > { %533 = vmatprep.mubr.f32.mxu0 %v4629_v4  ;;  %v432_v17 = vpop.permute.xlu1 %431  ;;  %v442_v22 = vpop.permute.xlu0 %441 }
  0xab   : > { %2582 = vmatmul.mubr.msk.f32.gmra.mrb[4].mxu0 %vm4614_vm0, %v314_v10 }
  0xac   : > { %539 = vmatprep.mubr.f32.mxu0 %v4629_v4  ;;  %v427_v31 = vpop.permute.xlu1 %426 }
  0xaf   : > { %2583 = vmatmul.mubr.msk.f32.gmra.mrb[6].mxu0 %vm4614_vm0, %v315_v11  ;;  %vm4688_vm0 = vmmov 1  }
  0xb0   : > { %815 = vmatprep.mubr.f32.mxu0 %v4629_v4 }
 0x176   : > { %v523_v12 = vpop.f32.mrb[0].mxu0 }
 0x177   : > { %v525_v14 = vpop.f32.mrb[1].mxu0  ;;  %v3574_v36 = vadd.f32 %v523_v12, %v427_v31 }
 0x178   : > { %v3576_v37 = vadd.f32 %v525_v14, %v427_v31 }
 0x17a   : > { %v529_v15 = vpop.f32.mrb[2].mxu0  ;;  %v3244_v42 = vpack.i.bf16 %v3574_v36, %v3576_v37  ;;  %v3259_v44 = vpack.i.bf16 %v3576_v37, %v3574_v36 }
 0x17b   : > { %v531_v16 = vpop.f32.mrb[3].mxu0  ;;  %v3563_v25 = vadd.f32 %v529_v15, %v432_v17 }
 0x17c   : > { %v3565_v26 = vadd.f32 %v531_v16, %v432_v17 }
 0x17e   : > { %v535_v18 = vpop.f32.mrb[4].mxu0  ;;  %v3224_v41 = vpack.i.bf16 %v3565_v26, %v3563_v25  ;;  %v3254_v43 = vpack.i.bf16 %v3563_v25, %v3565_v26 }
 0x17f   : > { %v3559_v19 = vadd.f32 %v535_v18, %v437_v13  ;;  %v537_v20 = vpop.f32.mrb[5].mxu0 }
 0x180   : > { %v3561_v21 = vadd.f32 %v537_v20, %v437_v13 }
 0x182   : > { %v541_v27 = vpop.f32.mrb[6].mxu0  ;;  %v3219_v28 = vpack.i.bf16 %v3561_v21, %v3559_v19 }
 0x183   : > { %v3569_v32 = vadd.f32 %v541_v27, %v442_v22  ;;  %v543_v33 = vpop.f32.mrb[7].mxu0 }
 0x184   : > { %v3571_v34 = vadd.f32 %v543_v33, %v442_v22  ;;  %3220 = vrot.lane.b32.xlu1 %v3219_v28, %s3340_s10 }
 0x186   : > { %v3229_v40 = vpack.i.bf16 %v3571_v34, %v3569_v32 }
 0x188   : > { %3230 = vrot.lane.b32.xlu0 %v3229_v40, %s3338_s8  ;;  %3225 = vrot.lane.b32.xlu1 %v3224_v41, %s3339_s9  ;;  %v2785_v41 = vpack.c.bf16 %v3565_v26, %v3576_v37 }
 0x18c   : > { %3235 = vrot.lane.b32.xlu0 %v3229_v40, %s3340_s10  ;;  %3245 = vrot.lane.b32.xlu1 %v3244_v42, %s3341_s11 }
 0x190   : > { %3240 = vrot.lane.b32.xlu0 %v3219_v28, %s3337_s30  ;;  %743 = vrot.lane.b32.xlu1 %v3561_v21, %s3341_s11 }
 0x194   : > { %3250 = vrot.lane.b32.xlu0 %v3229_v40, %s3339_s9  ;;  %3255 = vrot.lane.b32.xlu1 %v3254_v43, %s3342_s12 }
 0x198   : > { %741 = vrot.lane.b32.xlu0 %v3559_v19, %s3341_s11  ;;  %858 = vrot.lane.b32.xlu1 %v3563_v25, %s3343_s13 }
 0x19c   : > { %3260 = vrot.lane.b32.xlu0 %v3259_v44, %s3343_s13  ;;  %957 = vrot.lane.b32.xlu1 %v3576_v37, %s3344_s14 }
 0x1a0   : > { %860 = vrot.lane.b32.xlu0 %v3565_v26, %s3343_s13  ;;  %610 = vperm.xlu1 %3217, %v326_v45  }
 0x1a4   : > { %955 = vrot.lane.b32.xlu0 %v3574_v36, %s3344_s14  ;;  %605 = vperm.xlu1 %3217, %v325_v46  }
 0x1a8   : > { %615 = vperm.xlu0 %3218, %v327_v47  }
 0x1ac   : > { %600 = vperm.xlu0 %3218, %v324_v48  }
 0x1f6   : > { %v3221_v49 = vpop.permute.xlu1 %3220 }
 0x1f7   : > { %v3223_v50 = vunpack.i.h.bf16 %v3221_v49  ;;  %v3222_v51 = vunpack.i.l.bf16 %v3221_v49  ;;  %v2787_v49 = vpack.c.bf16 %v3563_v25, %v3574_v36 }
 0x1f9   : > { %v564_v59 = vsel %vm4615_vm4, %v3222_v51, %v3223_v50 }
 0x1fa   : > { %v3231_v52 = vpop.permute.xlu0 %3230  ;;  %v3226_v53 = vpop.permute.xlu1 %3225 }
 0x1fb   : > { %v3233_v54 = vunpack.i.h.bf16 %v3231_v52  ;;  %v3232_v55 = vunpack.i.l.bf16 %v3231_v52  ;;  %v3228_v60 = vunpack.i.h.bf16 %v3226_v53  ;;  %v3227_v61 = vunpack.i.l.bf16 %v3226_v53 }
 0x1fd   : > { %v555_v56 = vsel %vm4613_vm1, 0.0, %v3232_v55  ;;  %v552_v57 = vsel %vm4613_vm1, %v3232_v55, %v3233_v54  ;;  %v3628_v8 = vsel %vm4681_vm15, %v3227_v61, %v3228_v60  ;;  %vm3633_vm1 = vmpackc.low %vm3435_vm3, %vm4616_vm8  ;;  %v585_v15 = vsel %vm4681_vm15, 0.0, %v3227_v61  ;;  %v3716_v60 = vld [vmem:[%s4602_s3] sm:$0xff] }
 0x1fe   : > { %v3236_v62 = vpop.permute.xlu0 %3235  ;;  %v2773_v1 = vpack.c.bf16 %v564_v59, %v552_v57  ;;  %v2776_v2 = vpack.c.bf16 %v3222_v51, %v555_v56  ;;  %v3246_v7 = vpop.permute.xlu1 %3245  ;;  %vm3647_vm3 = vmpackc.low %vm3444_vm6, %vm3444_vm6  ;;  %v2812_v55 = vpack.c.bf16 %v3571_v34, %v3561_v21  ;;  %v2816_v61 = vpack.c.bf16 %v3576_v37, %v3628_v8 }
 0x1ff   : > { %v3238_v5 = vunpack.i.h.bf16 %v3236_v62  ;;  %v3237_v6 = vunpack.i.l.bf16 %v3236_v62  ;;  %v3247_v11 = vunpack.i.l.bf16 %v3246_v7  ;;  %vm3656_vm15 = vmpackc.low %vm4688_vm0, %vm3448_vm7  ;;  %v3248_v31 = vunpack.i.h.bf16 %v3246_v7 }
 0x200   : > { %2775 = vmatprep.subr.msk.bf16.mxu1 %vm3459_vm9, %v2773_v1  ;;  %v2819_v1 = vpack.c.bf16 %v3574_v36, %v585_v15 }
 0x201   : > { %2778 = vmatpush1.bf16.msk.msra.mxu1 %vm3472_vm11, %v2776_v2  ;;  %v572_v12 = vsel %vm4615_vm4, %v3237_v6, %v3238_v5  ;;  %v2782_v18 = vpack.c.bf16 %v585_v15, %v3237_v6  ;;  %v2797_v20 = vpack.c.bf16 %v3237_v6, %v3222_v51  ;;  %vm4686_vm4 = vcmask 121856  }
 0x202   : > { %v3241_v9 = vpop.permute.xlu0 %3240  ;;  %v2779_v16 = vpack.c.bf16 %v3628_v8, %v572_v12  ;;  %v2795_v17 = vpack.c.bf16 %v572_v12, %v564_v59  ;;  %vm4687_vm8 = vmmov %vm4686_vm4  ;;  %vm4695_vm11 = vcmask 7168   ;;  %v744_v56 = vpop.permute.xlu1 %743  ;;  %v2814_v59 = vpack.c.bf16 %v3569_v32, %v3559_v19 }
 0x203   : > { %v3243_v13 = vunpack.i.h.bf16 %v3241_v9  ;;  %v3242_v14 = vunpack.i.l.bf16 %v3241_v9 }
 0x204   : > { %2781 = vmatprep.subr.msk.bf16.mxu1 %vm3633_vm1, %v2779_v16  ;;  %2796 = vmatprep.subr.bf16.mxu0 %v2795_v17 }
 0x205   : > { %v723_v22 = vsel %vm4686_vm4, %v3242_v14, %v3243_v13  ;;  %v726_v27 = vsel %vm4687_vm8, 0.0, %v3242_v14  ;;  %vm4691_vm4 = vcmask 1039360   ;;  %vm4692_vm8 = vmpackc.low %vm3439_vm5, %vm3444_vm6  ;;  %2799 = vmatpush1.bf16.msk.msra.mxu0 %vm3647_vm3, %v2797_v20  ;;  %v322_v13 = vld [vmem:[%s4602_s3 + $0x10] sm:$0xff] }
 0x206   : > { %v2800_v33 = vpack.c.bf16 %v3576_v37, %v723_v22  ;;  %v3251_v40 = vpop.permute.xlu0 %3250  ;;  %v3666_v42 = vsel %vm4691_vm4, %v3247_v11, 0.0  ;;  %v2803_v43 = vpack.c.bf16 %v3574_v36, %v726_v27  ;;  %2784 = vmatpush1.bf16.msk.msra.mxu1 %vm4692_vm8, %v2782_v18  ;;  %vm3681_vm4 = vmpackc.low %vm4688_vm0, %vm3464_vm10  ;;  %vm4697_vm8 = vcmask 1039360   ;;  %v3256_v5 = vpop.permute.xlu1 %3255  ;;  %v3734_v37 = vld [vmem:[%s4602_s3 + $0x8] sm:$0xff] }
 0x207   : > { %v3253_v44 = vunpack.i.h.bf16 %v3251_v40  ;;  %v3252_v45 = vunpack.i.l.bf16 %v3251_v40  ;;  %2786 = vmatprep.subr.bf16.mxu1 %v2785_v41  ;;  %vm4696_vm6 = vmmov %vm4695_vm11  ;;  %v3690_v50 = vsel %vm4697_vm8, %v3248_v31, %v3247_v11  ;;  %v2806_v51 = vpack.c.bf16 %v3666_v42, %v3565_v26 }
 0x208   : > { %2802 = vmatprep.subr.msk.bf16.mxu0 %vm3656_vm15, %v2800_v33  ;;  %v2809_v54 = vpack.c.bf16 %v3690_v50, %v3563_v25  ;;  %v3257_v8 = vunpack.i.l.bf16 %v3256_v5  ;;  %v2842_v9 = vpack.c.bf16 %v3561_v21, %v3666_v42  ;;  %v4709_v31 = vmov 0 }
 0x209   : > { %v592_v47 = vsel %vm4695_vm11, %v3252_v45, %v3253_v44  ;;  %v595_v48 = vsel %vm4696_vm6, 0.0, %v3252_v45  ;;  %2805 = vmatpush1.bf16.msk.msra.mxu0 %vm3681_vm4, %v2803_v43  ;;  %vm4698_vm6 = vmmov %vm4697_vm8  ;;  %vm4699_vm11 = vcmask 588800  }
 0x20a   : > { %v2789_v52 = vpack.c.bf16 %v3561_v21, %v592_v47  ;;  %v2792_v53 = vpack.c.bf16 %v3559_v19, %v595_v48  ;;  %2788 = vmatpush1.bf16.msra.mxu1 %v2787_v49  ;;  %2808 = vmatprep.subr.msk.bf16.mxu0 %vm3497_vm12, %v2806_v51  ;;  %v742_v57 = vpop.permute.xlu0 %741  ;;  %v748_v62 = vsel %vm4698_vm6, %v744_v56, 0.0  ;;  %v2822_v2 = vpack.c.bf16 %v592_v47, %v3565_v26  ;;  %vm4700_vm8 = vmmov %vm4698_vm6  ;;  %v859_v16 = vpop.permute.xlu1 %858 }
 0x20b   : > { %v745_v36 = vsel %vm4700_vm8, %v742_v57, %v744_v56  ;;  %vm3746_vm6 = vmpackc.low %vm3439_vm5, %vm4688_vm0  ;;  %v4701_v26 = vmov 0  ;;  %v2825_v7 = vpack.c.bf16 %v595_v48, %v3563_v25  ;;  %v3258_v25 = vunpack.i.h.bf16 %v3256_v5 }
 0x20c   : > { %2791 = vmatprep.subr.msk.bf16.mxu1 %vm3459_vm9, %v2789_v52  ;;  %v4702_v26 = vsel %vm3746_vm6, 4294967295, %v4701_v26  ;;  %vm4703_vm8 = vmmov %vm4699_vm11  ;;  %v2845_v21 = vpack.c.bf16 %v3559_v19, %v3690_v50  ;;  %v2848_v15 = vpack.c.bf16 %v748_v62, %v3571_v34  ;;  %vm4705_vm0 = vcmask 916480   ;;  %v323_v19 = vld [vmem:[%s4602_s3 + $0x18] sm:$0xff] }
 0x20d   : > { %2811 = vmatpush1.bf16.msk.msra.mxu0 %vm3509_vm13, %v2809_v54  ;;  %v2851_v22 = vpack.c.bf16 %v745_v36, %v3569_v32 }
 0x20e   : > { %2794 = vmatpush1.bf16.msk.msra.mxu1 %vm3525_vm14, %v2792_v53  ;;  %2813 = vmatprep.subr.bf16.mxu0 %v2812_v55  ;;  %v3261_v6 = vpop.permute.xlu0 %3260 }
 0x20f   : > { %646 = vmatprep.subr.mxu1 %v3571_v34  ;;  %v3263_v11 = vunpack.i.h.bf16 %v3261_v6  ;;  %v3262_v12 = vunpack.i.l.bf16 %v3261_v6 }
 0x211   : > { %2815 = vmatpush1.bf16.msra.mxu0 %v2814_v59  ;;  %v854_v17 = vsel %vm4705_vm0, %v3262_v12, %v3263_v11 }
 0x212   : > { %647 = vmatpush1.msra.mxu1 %v3569_v32  ;;  %2606 = vmatprep.subr.msk.mxu0 %vm3448_vm7, %v748_v62  ;;  %v861_v20 = vpop.permute.xlu0 %860  ;;  %v958_v32 = vpop.permute.xlu1 %957 }
 0x213   : > { %2594 = vmatmul.mubr.msk.f32.vlgmr.msra.gmra.mrb[0].mxu1 %vm4699_vm11, %v3716_v60  ;;  %2818 = vmatprep.subr.msk.bf16.mxu1 %vm3459_vm9, %v2816_v61  ;;  %v2854_v33 = vpack.c.bf16 %v861_v20, %v3263_v11 }
 0x214   : > { %700 = vmatprep.mubr.f32.mxu1 %v4629_v4  ;;  %2821 = vmatpush1.bf16.msk.msra.mxu1 %vm3525_vm14, %v2819_v1 }
 0x215   : > { %2824 = vmatprep.subr.msk.bf16.mxu1 %vm3633_vm1, %v2822_v2  ;;  %2607 = vmatpush1.msk.msra.mxu0 %vm3464_vm10, %v745_v36 }
 0x216   : > { %2608 = vmatmul.mubr.msk.f32.vlgmr.msra.gmra.mrb[8].mxu0 %vm4703_vm8, %v3716_v60  ;;  %2839 = vmatprep.subr.bf16.mxu0 %v2785_v41  ;;  %v956_v43 = vpop.permute.xlu0 %955 }
 0x217   : > { %2595 = vmatmul.mubr.msk.f32.gmra.mrb[2].mxu1 %vm4699_vm11, %v3734_v37  ;;  %2841 = vmatpush1.bf16.msra.mxu0 %v2787_v49  ;;  %vm4704_vm11 = vcmask 924672  }
 0x218   : > { %706 = vmatprep.mubr.f32.mxu1 %v4629_v4  ;;  %2827 = vmatpush1.bf16.msk.msra.mxu1 %vm3746_vm6, %v2825_v7  ;;  %v847_v14 = vsel %vm4704_vm11, %v3257_v8, 0.0  ;;  %vm4706_vm6 = vmmov %vm4703_vm8  ;;  %v844_v34 = vsel %vm4704_vm11, %v3258_v25, %v3257_v8 }
 0x219   : > { %2829 = vmatprep.subr.bf16.mxu1 %v2812_v55  ;;  %2844 = vmatprep.subr.msk.bf16.mxu0 %vm3656_vm15, %v2842_v9  ;;  %v2832_v18 = vpack.c.bf16 %v3263_v11, %v847_v14  ;;  %v2835_v27 = vpack.c.bf16 %v854_v17, %v844_v34  ;;  %vm4707_vm0 = vmmov %vm4706_vm6 }
 0x21a   : > { %821 = vmatprep.mubr.f32.mxu0 %v4629_v4  ;;  %vm4712_vm11 = vmmov %vm4707_vm0 }
 0x21b   : > { %2596 = vmatmul.mubr.msk.f32.gmra.mrb[4].mxu1 %vm4703_vm8, %v322_v13  ;;  %2609 = vmatmul.mubr.msk.f32.gmra.mrb[10].mxu0 %vm4706_vm6, %v3734_v37  ;;  %vm4708_vm6 = vcmask 916480  }
 0x21c   : > { %712 = vmatprep.mubr.f32.mxu1 %v4629_v4  ;;  %2831 = vmatpush1.bf16.msra.mxu1 %v2814_v59  ;;  %vm3790_vm8 = vmpackc.low %vm4708_vm6, %vm4708_vm6 }
 0x21d   : > { %2847 = vmatpush1.bf16.msk.msra.mxu0 %vm3681_vm4, %v2845_v21  ;;  %2834 = vmatprep.subr.msk.bf16.mxu1 %vm3516_vm2, %v2832_v18  ;;  %v4710_v31 = vsel %vm3790_vm8, 4294967295, %v4709_v31  ;;  %vm4713_vm2 = vmmov %vm4708_vm6 }
 0x21e   : > { %2850 = vmatprep.subr.msk.bf16.mxu0 %vm3497_vm12, %v2848_v15  ;;  %827 = vmatprep.mubr.f32.mxu0 %v4629_v4  ;;  %4711 = vst [vmem:[#allocation3_spill] sm:$0xff] %v4710_v31  ;;  %v862_v40 = vsel %vm4713_vm2, %v859_v16, %v861_v20  ;;  %vm4715_vm6 = vmmov %vm4712_vm11 }
 0x21f   : > { %2597 = vmatmul.mubr.msk.f32.gmra.mrb[6].mxu1 %vm4707_vm0, %v323_v19  ;;  %2610 = vmatmul.mubr.msk.f32.gmra.mrb[12].mxu0 %vm4712_vm11, %v322_v13  ;;  %vm4714_vm0 = vmmov %vm4713_vm2  ;;  %v2857_v41 = vpack.c.bf16 %v862_v40, %v854_v17  ;;  %vm4716_vm2 = vcmask 908288   ;;  %v3849_v56 = vpop.permute.xlu1 %610 }
 0x220   : > { %930 = vmatprep.mubr.f32.mxu1 %v4629_v4  ;;  %2837 = vmatpush1.bf16.msk.msra.mxu1 %vm3525_vm14, %v2835_v27  ;;  %v962_v42 = vsel %vm4716_vm2, %v958_v32, 0.0  ;;  %vm4717_vm11 = vmmov %vm4715_vm6 }
 0x221   : > { %2853 = vmatpush1.bf16.msk.msra.mxu0 %vm3509_vm13, %v2851_v22  ;;  %2619 = vmatprep.subr.msk.mxu1 %vm4714_vm0, %v861_v20  ;;  %vm4718_vm0 = vmmov %vm4716_vm2 }
 0x222   : > { %2856 = vmatprep.subr.msk.bf16.mxu0 %vm3790_vm8, %v2854_v33  ;;  %833 = vmatprep.mubr.f32.mxu0 %v4629_v4  ;;  %v959_v44 = vsel %vm4718_vm0, %v956_v43, %v958_v32  ;;  %vm4719_vm2 = vmmov %vm4715_vm6 }
 0x223   : > { %2611 = vmatmul.mubr.msk.f32.gmra.mrb[14].mxu0 %vm4715_vm6, %v323_v19  ;;  %vm4721_vm8 = vmmov %vm4719_vm2  ;;  %v3871_v12 = vpop.permute.xlu1 %605 }
 0x224   : > { %883 = vmatpush1.msra.mxu1 %v862_v40  ;;  %1029 = vmatprep.mubr.f32.mxu0 %v4629_v4  ;;  %vm4722_vm0 = vmmov %vm4719_vm2 }
 0x225   : > { %2858 = vmatpush1.bf16.msra.mxu0 %v2857_v41  ;;  %2620 = vmatmul.mubr.msk.f32.vlgmr.msra.gmra.mrb[8].mxu1 %vm4717_vm11, %v3716_v60  ;;  %vm4720_vm11 = vmmov %vm4719_vm2 }
 0x226   : > { %2630 = vmatprep.subr.msk.mxu0 %vm3448_vm7, %v962_v42  ;;  %936 = vmatprep.mubr.f32.mxu1 %v4629_v4 }
 0x227   : > { %v616_v57 = vpop.permute.xlu0 %615 }
 0x229   : > { %2631 = vmatpush1.msk.msra.mxu0 %vm3464_vm10, %v959_v44  ;;  %2621 = vmatmul.mubr.msk.f32.gmra.mrb[10].mxu1 %vm4715_vm6, %v3734_v37  ;;  %vm4723_vm10 = vmmov %vm4722_vm0 }
 0x22a   : > { %2632 = vmatmul.mubr.msk.f32.vlgmr.msra.gmra.mrb[16].mxu0 %vm4719_vm2, %v3716_v60  ;;  %942 = vmatprep.mubr.f32.mxu1 %v4629_v4  ;;  %vm4724_vm6 = vmmov %vm4722_vm0 }
 0x22b   : > { %1035 = vmatprep.mubr.f32.mxu0 %v4629_v4 }
 0x22d   : > { %2622 = vmatmul.mubr.msk.f32.gmra.mrb[12].mxu1 %vm4720_vm11, %v322_v13  ;;  %vm4740_vm11 = vcmask 7168  }
 0x22e   : > { %2633 = vmatmul.mubr.msk.f32.gmra.mrb[18].mxu0 %vm4721_vm8, %v3734_v37  ;;  %948 = vmatprep.mubr.f32.mxu1 %v4629_v4  ;;  %vm4738_vm8 = vcmask 138240  }
 0x22f   : > { %1041 = vmatprep.mubr.f32.mxu0 %v4629_v4  ;;  %vm4739_vm2 = vmmov %vm4738_vm8 }
 0x231   : > { %2623 = vmatmul.mubr.msk.f32.gmra.mrb[14].mxu1 %vm4722_vm0, %v323_v19  ;;  %vm4741_vm0 = vmmov %vm4740_vm11 }
 0x232   : > { %2634 = vmatmul.mubr.msk.f32.gmra.mrb[20].mxu0 %vm4723_vm10, %v322_v13  ;;  %1182 = vmatprep.mubr.f32.mxu1 %v4629_v4  ;;  %v3873_v13 = vpop.permute.xlu0 %600  ;;  %vm4737_vm10 = vcmask 130048  }
 0x233   : > { %1047 = vmatprep.mubr.f32.mxu0 %v4629_v4 }
 0x236   : > { %2635 = vmatmul.mubr.msk.f32.gmra.mrb[22].mxu0 %vm4724_vm6, %v323_v19  ;;  %vm4742_vm6 = vmmov %vm4737_vm10 }
 0x237   : > { %1263 = vmatprep.mubr.f32.mxu0 %v4629_v4 }
 0x2e6   : > { %v3833_v45 = vpop.f32.mrb[0].mxu1 }
 0x2e7   : > { %v3835_v47 = vpop.f32.mrb[1].mxu1 }
 0x2e9   : > { %v3839_v49 = vpop.f32.mrb[8].mxu0 }
 0x2ea   : > { %v3837_v48 = vpop.f32.mrb[2].mxu1  ;;  %v3843_v51 = vpop.f32.mrb[9].mxu0 }
 0x2eb   : > { %v3841_v50 = vpop.f32.mrb[3].mxu1 }
 0x2ee   : > { %v3845_v52 = vpop.f32.mrb[4].mxu1  ;;  %v823_v53 = vpop.f32.mrb[10].mxu0 }
 0x2ef   : > { %v3847_v54 = vpop.f32.mrb[5].mxu1  ;;  %v825_v55 = vpop.f32.mrb[11].mxu0  ;;  %v3902_v42 = vadd.f32 %v823_v53, %v3871_v12 }
 0x2f0   : > { %v3905_v43 = vadd.f32 %v825_v55, %v3871_v12 }
 0x2f2   : > { %v714_v59 = vpop.f32.mrb[6].mxu1  ;;  %v829_v61 = vpop.f32.mrb[12].mxu0  ;;  %v3269_v53 = vpack.i.bf16 %v3905_v43, %v3902_v42 }
 0x2f3   : > { %v3851_v60 = vadd.f32 %v714_v59, %v616_v57  ;;  %v716_v62 = vpop.f32.mrb[7].mxu1  ;;  %v3854_v1 = vadd.f32 %v829_v61, %v3849_v56  ;;  %v831_v5 = vpop.f32.mrb[13].mxu0 }
 0x2f4   : > { %v3856_v2 = vadd.f32 %v716_v62, %v616_v57  ;;  %v3859_v37 = vadd.f32 %v831_v5, %v3849_v56 }
 0x2f5   : > { %v3863_v36 = vpack.c.bf16 %v3854_v1, %v3851_v60 }
 0x2f6   : > { %v835_v6 = vpop.f32.mrb[14].mxu0  ;;  %v3867_v7 = vpack.c.bf16 %v3859_v37, %v3856_v2 }
 0x2f7   : > { %v837_v8 = vpop.f32.mrb[15].mxu0 }
 0x2f8   : > { %v932_v9 = vpop.f32.mrb[8].mxu1 }
 0x2f9   : > { %v3869_v11 = vpop.f32.mrb[9].mxu1 }
 0x2fc   : > { %v938_v25 = vpop.f32.mrb[10].mxu1 }
 0x2fd   : > { %v1031_v21 = vpop.f32.mrb[16].mxu0  ;;  %v3876_v14 = vadd.f32 %v938_v25, %v3871_v12  ;;  %v940_v16 = vpop.f32.mrb[11].mxu1  ;;  %v3910_v25 = vadd.f32 %v835_v6, %v616_v57 }
 0x2fe   : > { %v3879_v15 = vadd.f32 %v1031_v21, %v3873_v13  ;;  %v1033_v17 = vpop.f32.mrb[17].mxu0  ;;  %v3882_v18 = vadd.f32 %v940_v16, %v3871_v12  ;;  %v3912_v21 = vadd.f32 %v837_v8, %v616_v57 }
 0x2ff   : > { %v3885_v19 = vadd.f32 %v1033_v17, %v3873_v13 }
 0x300   : > { %v3889_v20 = vpack.c.bf16 %v3879_v15, %v3876_v14  ;;  %v944_v34 = vpop.f32.mrb[12].mxu1  ;;  %v3289_v8 = vpack.i.bf16 %v3912_v21, %v3910_v25 }
 0x301   : > { %v1037_v22 = vpop.f32.mrb[18].mxu0  ;;  %v3893_v27 = vpack.c.bf16 %v3885_v19, %v3882_v18  ;;  %v3896_v33 = vadd.f32 %v944_v34, %v3849_v56  ;;  %v946_v40 = vpop.f32.mrb[13].mxu1 }
 0x302   : > { %4725 = vst [vmem:[#allocation4_spill] sm:$0xff] %v3889_v20  ;;  %v1039_v32 = vpop.f32.mrb[19].mxu0  ;;  %v3899_v41 = vadd.f32 %v946_v40, %v3849_v56 }
 0x303   : > { %4726 = vst [vmem:[#allocation5_spill] sm:$0xff] %v3893_v27  ;;  %4727 = vst [vmem:[#allocation6_spill] sm:$0xff] %v3896_v33 }
 0x304   : > { %4728 = vst [vmem:[#allocation7_spill] sm:$0xff] %v3899_v41  ;;  %v950_v44 = vpop.f32.mrb[14].mxu1  ;;  %v3264_v61 = vpack.i.bf16 %v3899_v41, %v3896_v33 }
 0x305   : > { %v1043_v59 = vpop.f32.mrb[20].mxu0  ;;  %v952_v62 = vpop.f32.mrb[15].mxu1  ;;  %v3921_v40 = vadd.f32 %v950_v44, %v616_v57  ;;  %v3943_v44 = vadd.f32 %v3847_v54, %v3849_v56  ;;  %v3962_v54 = vadd.f32 %v3835_v47, %v3873_v13  ;;  %v3986_v47 = vadd.f32 %v3869_v11, %v3873_v13 }
 0x306   : > { %v1045_v5 = vpop.f32.mrb[21].mxu0  ;;  %3265 = vrot.lane.b32.xlu0 %v3264_v61, %s3340_s10  ;;  %v3923_v4 = vadd.f32 %v952_v62, %v616_v57  ;;  %v3946_v62 = vadd.f32 %v1037_v22, %v3871_v12 }
 0x307   : > { %4731 = vst [vmem:[#allocation10_spill] sm:$0xff] %v3921_v40 }
 0x308   : > { %4732 = vst [vmem:[#allocation11_spill] sm:$0xff] %v3923_v4  ;;  %4735 = vst [vmem:[#allocation14_spill] sm:$0xff] %v3946_v62 }
 0x309   : > { %v1049_v16 = vpop.f32.mrb[22].mxu0 }
 0x30a   : > { %v3916_v17 = vadd.f32 %v1049_v16, %v616_v57  ;;  %v1051_v55 = vpop.f32.mrb[23].mxu0  ;;  %3270 = vrot.lane.b32.xlu0 %v3269_v53, %s3339_s9  ;;  %v3932_v16 = vadd.f32 %v1043_v59, %v3849_v56  ;;  %v3949_v59 = vadd.f32 %v1039_v32, %v3871_v12  ;;  %v3969_v32 = vadd.f32 %v932_v9, %v3873_v13 }
 0x30b   : > { %v3918_v34 = vadd.f32 %v1051_v55, %v616_v57  ;;  %v3935_v55 = vadd.f32 %v1045_v5, %v3849_v56  ;;  %v3279_v57 = vpack.i.bf16 %v3923_v4, %v3921_v40  ;;  %v3319_v9 = vpack.i.bf16 %v3902_v42, %v3905_v43 }
 0x30c   : > { %4729 = vst [vmem:[#allocation8_spill] sm:$0xff] %v3916_v17  ;;  %4733 = vst [vmem:[#allocation12_spill] sm:$0xff] %v3932_v16  ;;  %v3309_v22 = vpack.i.bf16 %v3949_v59, %v3946_v62  ;;  %v4757_v62 = vmov 0.0  }
 0x30d   : > { %4730 = vst [vmem:[#allocation9_spill] sm:$0xff] %v3918_v34  ;;  %v3274_v6 = vpack.i.bf16 %v3918_v34, %v3916_v17  ;;  %4734 = vst [vmem:[#allocation13_spill] sm:$0xff] %v3935_v55  ;;  %v3284_v5 = vpack.i.bf16 %v3935_v55, %v3932_v16 }
 0x30e   : > { %3290 = vrot.lane.b32.xlu0 %v3289_v8, %s3339_s9  ;;  %4736 = vst [vmem:[#allocation15_spill] sm:$0xff] %v3949_v59 }
 0x30f   : > { %3275 = vrot.lane.b32.xlu1 %v3274_v6, %s3338_s8 }
 0x312   : > { %3300 = vrot.lane.b32.xlu0 %v3264_v61, %s3337_s30  ;;  %v3958_v61 = vadd.f32 %v3833_v45, %v3873_v13  ;;  %v3978_v45 = vadd.f32 %v3845_v52, %v3849_v56  ;;  %v3995_v52 = vadd.f32 %v3837_v48, %v3871_v12  ;;  %v4002_v56 = vadd.f32 %v3839_v49, %v3873_v13  ;;  %v329_v49 = vld [vmem:[%s4605_s6] sm:$0x7] }
 0x313   : > { %3280 = vrot.lane.b32.xlu1 %v3279_v57, %s3340_s10  ;;  %v4015_v48 = vadd.f32 %v3841_v50, %v3871_v12 }
 0x314   : > { %v3304_v53 = vpack.i.bf16 %v3958_v61, %v3962_v54  ;;  %v3324_v11 = vpack.i.bf16 %v3962_v54, %v3958_v61 }
 0x316   : > { %1375 = vrot.lane.b32.xlu0 %v3943_v44, %s3341_s11 }
 0x317   : > { %3285 = vrot.lane.b32.xlu1 %v3284_v5, %s3340_s10 }
 0x31a   : > { %3310 = vrot.lane.b32.xlu0 %v3309_v22, %s3339_s9 }
 0x31b   : > { %3295 = vrot.lane.b32.xlu1 %v3274_v6, %s3340_s10 }
 0x31e   : > { %1681 = vrot.lane.b32.xlu0 %v3969_v32, %s3341_s11 }
 0x31f   : > { %3305 = vrot.lane.b32.xlu1 %v3304_v53, %s3341_s11 }
 0x322   : > { %1987 = vrot.lane.b32.xlu0 %v3899_v41, %s3341_s11 }
 0x323   : > { %1373 = vrot.lane.b32.xlu1 %v3978_v45, %s3341_s11 }
 0x326   : > { %3320 = vrot.lane.b32.xlu0 %v3319_v9, %s3342_s12 }
 0x327   : > { %1683 = vrot.lane.b32.xlu1 %v3986_v47, %s3341_s11 }
 0x32a   : > { %2086 = vrot.lane.b32.xlu0 %v3995_v52, %s3343_s13 }
 0x32b   : > { %3315 = vrot.lane.b32.xlu1 %v3274_v6, %s3339_s9  ;;  %v4026_v6 = vadd.f32 %v3843_v51, %v3873_v13 }
 0x32e   : > { %2167 = vrot.lane.b32.xlu0 %v4002_v56, %s3343_s13 }
 0x32f   : > { %1985 = vrot.lane.b32.xlu1 %v3896_v33, %s3341_s11  ;;  %s2748_s11 = sshll.u32 %s4815_s25, 7 }
 0x332   : > { %2246 = vrot.lane.b32.xlu0 %v3902_v42, %s3343_s13 }
 0x333   : > { %3325 = vrot.lane.b32.xlu1 %v3324_v11, %s3343_s13 }
 0x336   : > { %2327 = vrot.lane.b32.xlu0 %v3962_v54, %s3344_s14 }
 0x337   : > { %2088 = vrot.lane.b32.xlu1 %v4015_v48, %s3343_s13 }
 0x33a   : > { %1112 = vperm.xlu0 %3218, %v329_v49  }
 0x33b   : > { %2169 = vrot.lane.b32.xlu1 %v4026_v6, %s3343_s13 }
 0x33f   : > { %2248 = vrot.lane.b32.xlu1 %v3905_v43, %s3343_s13 }
 0x343   : > { %2325 = vrot.lane.b32.xlu1 %v3958_v61, %s3344_s14  ;;  %s4548_s14 = scalar_lea.vmem %s4606_s7, %s2748_s11 }
 0x378   : > { %v3266_v50 = vpop.permute.xlu0 %3265 }
 0x379   : > { %v3268_v12 = vunpack.i.h.bf16 %v3266_v50  ;;  %v3267_v8 = vunpack.i.l.bf16 %v3266_v50 }
 0x37b   : > { %v1072_v51 = vsel %vm4737_vm10, %v3267_v8, %v3268_v12  ;;  %vm4743_vm10 = vnez %v4671_v39  ;;  %v4056_v39 = vpack.c.bf16 %v4015_v48, %v3962_v54 }
 0x37c   : > { %v3271_v57 = vpop.permute.xlu0 %3270 }
 0x37d   : > { %v3273_v13 = vunpack.i.h.bf16 %v3271_v57  ;;  %v3272_v9 = vunpack.i.l.bf16 %v3271_v57 }
 0x37f   : > { %v4040_v50 = vsel %vm4740_vm11, %v3272_v9, %v3273_v13  ;;  %v4043_v12 = vsel %vm4741_vm0, 0.0, %v3272_v9  ;;  %vm4746_vm11 = vmmov %vm4741_vm0 }
 0x380   : > { %v3291_v34 = vpop.permute.xlu0 %3290  ;;  %vm4747_vm0 = vmmov %vm4742_vm6 }
 0x381   : > { %v3276_v5 = vpop.permute.xlu1 %3275 }
 0x382   : > { %v3278_v22 = vunpack.i.h.bf16 %v3276_v5  ;;  %v3277_v53 = vunpack.i.l.bf16 %v3276_v5  ;;  %v3293_v5 = vunpack.i.h.bf16 %v3291_v34 }
 0x384   : > { %v1060_v11 = vsel %vm4738_vm8, %v3277_v53, %v3278_v22  ;;  %v1063_v49 = vsel %vm4739_vm2, 0.0, %v3277_v53  ;;  %v3292_v22 = vunpack.i.l.bf16 %v3291_v34  ;;  %vm4744_vm8 = vnez %v4663_v29 }
 0x385   : > { %v2859_v31 = vpack.c.bf16 %v1072_v51, %v1060_v11  ;;  %v2862_v0 = vpack.c.bf16 %v3267_v8, %v1063_v49  ;;  %v3281_v17 = vpop.permute.xlu1 %3280  ;;  %vm4745_vm2 = vmpackc.low %vm3439_vm5, %vm4744_vm8  ;;  %vm4749_vm5 = vmmov 1  }
 0x386   : > { %v3283_v16 = vunpack.i.h.bf16 %v3281_v17  ;;  %v3282_v55 = vunpack.i.l.bf16 %v3281_v17 }
 0x387   : > { %2861 = vmatprep.subr.msk.bf16.mxu1 %vm3459_vm9, %v2859_v31 }
 0x388   : > { %v1082_v57 = vsel %vm4742_vm6, %v3282_v55, %v3283_v16  ;;  %2864 = vmatpush1.bf16.msk.msra.mxu1 %vm4743_vm10, %v2862_v0  ;;  %v2868_v49 = vpack.c.bf16 %v4043_v12, %v3282_v55  ;;  %v2883_v13 = vpack.c.bf16 %v3282_v55, %v3267_v8  ;;  %v4064_v0 = vsel %vm4746_vm11, %v3292_v22, %v3293_v5  ;;  %vm4748_vm6 = vmmov %vm4746_vm11 }
 0x389   : > { %v3286_v53 = vpop.permute.xlu1 %3285  ;;  %v2865_v11 = vpack.c.bf16 %v4040_v50, %v1082_v57  ;;  %v2881_v17 = vpack.c.bf16 %v1082_v57, %v1072_v51  ;;  %v4073_v16 = vpack.c.bf16 %v3995_v52, %v3958_v61  ;;  %v4076_v24 = vsel %vm4748_vm6, 0.0, %v3292_v22  ;;  %vm4082_vm10 = vmpackc.low %vm4749_vm5, %vm4744_vm8 }
 0x38a   : > { %v3288_v31 = vunpack.i.h.bf16 %v3286_v53  ;;  %v4050_v40 = vunpack.i.l.bf16 %v3286_v53  ;;  %v4088_v9 = vpack.c.bf16 %v3943_v44, %v4064_v0  ;;  %v4095_v22 = vpack.c.bf16 %v4026_v6, %v4015_v48  ;;  %vm4754_vm8 = vmmov %vm4747_vm0 }
 0x38b   : > { %2867 = vmatprep.subr.msk.bf16.mxu1 %vm3633_vm1, %v2865_v11  ;;  %2882 = vmatprep.subr.bf16.mxu0 %v2881_v17  ;;  %v4099_v29 = vpack.c.bf16 %v3978_v45, %v4076_v24  ;;  %vm4756_vm11 = vcmask 121856   ;;  %vm4760_vm5 = vcmask 1039360  }
 0x38c   : > { %2870 = vmatpush1.bf16.msk.msra.mxu1 %vm4745_vm2, %v2868_v49  ;;  %2885 = vmatpush1.bf16.msk.msra.mxu0 %vm3647_vm3, %v2883_v13  ;;  %v1195_v34 = vsel %vm4747_vm0, %v4050_v40, %v3288_v31  ;;  %4752 = vst [vmem:[#allocation16_spill] sm:$0xff] %v4088_v9  ;;  %v2888_v5 = vpack.c.bf16 %v3958_v61, %v4050_v40  ;;  %v3301_v31 = vpop.permute.xlu0 %3300  ;;  %vm4755_vm2 = vcmask 588800   ;;  %vm4758_vm0 = vmmov %vm4756_vm11 }
 0x38d   : > { %2872 = vmatprep.subr.bf16.mxu1 %v4056_v39  ;;  %v2886_v8 = vpack.c.bf16 %v3962_v54, %v1195_v34  ;;  %v3296_v53 = vpop.permute.xlu1 %3295  ;;  %4753 = vst [vmem:[#allocation17_spill] sm:$0xff] %v4099_v29  ;;  %v4112_v49 = vpack.c.bf16 %v4002_v56, %v3995_v52  ;;  %v4117_v13 = vpack.c.bf16 %v3856_v2, %v3943_v44  ;;  %v3303_v4 = vunpack.i.h.bf16 %v3301_v31  ;;  %vm4759_vm6 = vmmov %vm4755_vm2 }
 0x38e   : > { %v3298_v11 = vunpack.i.h.bf16 %v3296_v53  ;;  %v3297_v17 = vunpack.i.l.bf16 %v3296_v53  ;;  %v3302_v33 = vunpack.i.l.bf16 %v3301_v31  ;;  %v2901_v41 = vpack.c.bf16 %v4050_v40, %v3282_v55 }
 0x38f   : > { %2887 = vmatprep.subr.bf16.mxu0 %v2886_v8  ;;  %v4123_v8 = vld [vmem:[%s4604_s5] sm:$0x7] }
 0x390   : > { %2874 = vmatpush1.bf16.msra.mxu1 %v4073_v16  ;;  %2890 = vmatpush1.bf16.msk.msra.mxu0 %vm4082_vm10, %v2888_v5  ;;  %v2899_v5 = vpack.c.bf16 %v1195_v34, %v1082_v57  ;;  %v1274_v53 = vsel %vm4754_vm8, %v3297_v17, %v3298_v11  ;;  %v1353_v55 = vsel %vm4756_vm11, %v3302_v33, %v3303_v4  ;;  %v1356_v4 = vsel %vm4758_vm0, 0.0, %v3302_v33  ;;  %vm4763_vm8 = vmmov %vm4760_vm5 }
 0x391   : > { %2877 = vmatprep.subr.msk.bf16.mxu1 %vm3459_vm9, %v4088_v9  ;;  %2892 = vmatprep.subr.bf16.mxu0 %v4095_v22  ;;  %v3306_v9 = vpop.permute.xlu1 %3305  ;;  %v2904_v57 = vpack.c.bf16 %v4015_v48, %v1274_v53  ;;  %v2906_v11 = vpack.c.bf16 %v3995_v52, %v3297_v17  ;;  %v2917_v59 = vpack.c.bf16 %v1274_v53, %v1195_v34  ;;  %vm4765_vm11 = vcmask 7168  }
 0x392   : > { %v3307_v31 = vunpack.i.l.bf16 %v3306_v9  ;;  %v2922_v20 = vpack.c.bf16 %v4026_v6, %v1353_v55  ;;  %v3308_v27 = vunpack.i.h.bf16 %v3306_v9  ;;  %v4163_v34 = vpack.c.bf16 %v3902_v42, %v4002_v56 }
 0x393   : > { %v2925_v33 = vpack.c.bf16 %v4002_v56, %v1356_v4  ;;  %v2938_v9 = vpack.c.bf16 %v3962_v54, %v4040_v50  ;;  %v2941_v53 = vpack.c.bf16 %v3958_v61, %v4043_v12  ;;  %v2944_v55 = vpack.c.bf16 %v4064_v0, %v4015_v48  ;;  %v4772_v4 = vld [vmem:[#allocation4_spill] sm:$0xff] }
 0x394   : > { %2880 = vmatpush1.bf16.msk.msra.mxu1 %vm3525_vm14, %v4099_v29  ;;  %2894 = vmatpush1.bf16.msra.mxu0 %v4112_v49  ;;  %v4131_v29 = vpack.c.bf16 %v3851_v60, %v3978_v45  ;;  %v2947_v48 = vpack.c.bf16 %v4076_v24, %v3995_v52  ;;  %vm4766_vm0 = vnez %v4669_v38  ;;  %v2964_v52 = vpack.c.bf16 %v3943_v44, %v4026_v6 }
 0x395   : > { %1134 = vmatprep.subr.mxu1 %v3856_v2  ;;  %2896 = vmatprep.subr.bf16.mxu0 %v4117_v13  ;;  %v1374_v12 = vpop.permute.xlu1 %1373 }
 0x398   : > { %1135 = vmatpush1.msra.mxu1 %v3851_v60  ;;  %2898 = vmatpush1.bf16.msra.mxu0 %v4131_v29 }
 0x399   : > { %2646 = vmatmul.mubr.msk.f32.vlgmr.msra.gmra.mrb[16].mxu1 %vm4755_vm2, %v4123_v8  ;;  %2900 = vmatprep.subr.bf16.mxu1 %v2899_v5  ;;  %v2919_v5 = vpack.c.bf16 %v3297_v17, %v4050_v40  ;;  %v4156_v40 = vsel %vm4760_vm5, %v3307_v31, 0.0 }
 0x39a   : > { %2903 = vmatpush1.bf16.msk.msra.mxu1 %vm3647_vm3, %v2901_v41  ;;  %1215 = vmatprep.subr.mxu0 %v3859_v37  ;;  %v4149_v41 = vpack.c.bf16 %v3905_v43, %v4026_v6  ;;  %v2928_v23 = vpack.c.bf16 %v4156_v40, %v3905_v43  ;;  %v2980_v6 = vpack.c.bf16 %v3856_v2, %v3905_v43 }
 0x39b   : > { %2905 = vmatprep.subr.bf16.mxu1 %v2904_v57  ;;  %1342 = vmatprep.mubr.f32.mxu1 %v4757_v62  ;;  %v4198_v57 = vpack.c.bf16 %v3910_v25, %v3854_v1 }
 0x39c   : > { %1216 = vmatpush1.msra.mxu0 %v3854_v1 }
 0x39d   : > { %2653 = vmatmul.mubr.msk.f32.vlgmr.msra.gmra.mrb[24].mxu0 %vm4759_vm6, %v4123_v8  ;;  %2918 = vmatprep.subr.bf16.mxu0 %v2917_v59  ;;  %v1376_v59 = vpop.permute.xlu0 %1375  ;;  %vm4767_vm6 = vnez %v4702_v26 }
 0x39e   : > { %2908 = vmatpush1.bf16.msk.msra.mxu1 %vm4082_vm10, %v2906_v11  ;;  %2921 = vmatpush1.bf16.msk.msra.mxu0 %vm3647_vm3, %v2919_v5  ;;  %vm4761_vm10 = vmmov %vm4760_vm5  ;;  %v4207_v54 = vsel %vm4763_vm8, %v1376_v59, 0.0  ;;  %v4771_v5 = vld [vmem:[#allocation5_spill] sm:$0xff] }
 0x39f   : > { %2910 = vmatprep.subr.bf16.mxu1 %v4149_v41  ;;  %2924 = vmatprep.subr.msk.bf16.mxu0 %vm3656_vm15, %v2922_v20  ;;  %v4171_v51 = vsel %vm4761_vm10, %v3308_v27, %v3307_v31  ;;  %v4186_v27 = vpack.c.bf16 %v3912_v21, %v3859_v37  ;;  %vm4762_vm3 = vmmov %vm4755_vm2  ;;  %v3002_v43 = vpack.c.bf16 %v4207_v54, %v3912_v21 }
 0x3a0   : > { %1447 = vmatprep.mubr.f32.mxu0 %v4757_v62  ;;  %v2931_v20 = vpack.c.bf16 %v4171_v51, %v3902_v42  ;;  %vm4764_vm2 = vmmov %vm4760_vm5 }
 0x3a1   : > { %v3311_v17 = vpop.permute.xlu0 %3310  ;;  %v4221_v0 = vsel %vm4764_vm2, %v1374_v12, %v1376_v59  ;;  %vm4768_vm5 = vmmov %vm4762_vm3  ;;  %v4774_v59 = vld [vmem:[#allocation14_spill] sm:$0xff] }
 0x3a2   : > { %2912 = vmatpush1.bf16.msra.mxu1 %v4163_v34  ;;  %2927 = vmatpush1.bf16.msk.msra.mxu0 %vm3681_vm4, %v2925_v33  ;;  %v3313_v50 = vunpack.i.h.bf16 %v3311_v17  ;;  %v3312_v61 = vunpack.i.l.bf16 %v3311_v17  ;;  %vm4769_vm10 = vmmov %vm4765_vm11 }
 0x3a3   : > { %2914 = vmatprep.subr.bf16.mxu1 %v3867_v7  ;;  %2930 = vmatprep.subr.msk.bf16.mxu0 %vm3497_vm12, %v2928_v23  ;;  %vm4770_vm8 = vmmov %vm4762_vm3 }
 0x3a4   : > { %v4224_v11 = vsel %vm4765_vm11, %v3312_v61, %v3313_v50  ;;  %v4239_v24 = vsel %vm4769_vm10, 0.0, %v3312_v61  ;;  %vm4775_vm2 = vmmov %vm4762_vm3  ;;  %vm4777_vm11 = vcmask 1039360  }
 0x3a5   : > { %v4243_v31 = vpack.c.bf16 %v3986_v47, %v4224_v11  ;;  %v4254_v44 = vpack.c.bf16 %v3969_v32, %v4239_v24  ;;  %v3018_v23 = vpack.c.bf16 %v4224_v11, %v3856_v2  ;;  %v3021_v2 = vpack.c.bf16 %v4239_v24, %v3851_v60  ;;  %v1682_v50 = vpop.permute.xlu0 %1681  ;;  %v4782_v11 = vld [vmem:[#allocation7_spill] sm:$0xff] }
 0x3a6   : > { %2916 = vmatpush1.bf16.msra.mxu1 %v3863_v36  ;;  %2933 = vmatpush1.bf16.msk.msra.mxu0 %vm3509_vm13, %v2931_v20  ;;  %v4776_v20 = vld [vmem:[#allocation16_spill] sm:$0xff] }
 0x3a7   : > { %1294 = vmatprep.subr.mxu1 %v3912_v21  ;;  %2935 = vmatprep.subr.bf16.mxu0 %v4186_v27 }
 0x3aa   : > { %1295 = vmatpush1.msra.mxu1 %v3910_v25  ;;  %2937 = vmatpush1.bf16.msra.mxu0 %v4198_v57 }
 0x3ab   : > { %2660 = vmatmul.mubr.msk.f32.vlgmr.msra.gmra.mrb[18].mxu1 %vm4762_vm3, %v4123_v8  ;;  %2940 = vmatprep.subr.msk.bf16.mxu1 %vm3459_vm9, %v2938_v9 }
 0x3ac   : > { %2943 = vmatpush1.bf16.msk.msra.mxu1 %vm3525_vm14, %v2941_v53  ;;  %2669 = vmatprep.subr.msk.mxu0 %vm3448_vm7, %v4207_v54 }
 0x3ad   : > { %2946 = vmatprep.subr.msk.bf16.mxu1 %vm3633_vm1, %v2944_v55  ;;  %1530 = vmatprep.mubr.f32.mxu1 %v4757_v62  ;;  %v4778_v55 = vld [vmem:[#allocation17_spill] sm:$0xff] }
 0x3ae   : > { %2670 = vmatpush1.msk.msra.mxu0 %vm4766_vm0, %v4221_v0 }
 0x3af   : > { %2671 = vmatmul.mubr.msk.f32.vlgmr.msra.gmra.mrb[26].mxu0 %vm4768_vm5, %v4123_v8  ;;  %2961 = vmatprep.subr.bf16.mxu0 %v4056_v39  ;;  %v2966_v39 = vpack.c.bf16 %v3978_v45, %v4002_v56  ;;  %v4263_v45 = vpack.c.bf16 %v3882_v18, %v3986_v47  ;;  %v4270_v56 = vpack.c.bf16 %v3876_v14, %v3969_v32  ;;  %vm4779_vm5 = vmmov %vm4777_vm11 }
 0x3b0   : > { %2949 = vmatpush1.bf16.msk.msra.mxu1 %vm4767_vm6, %v2947_v48  ;;  %2963 = vmatpush1.bf16.msra.mxu0 %v4073_v16  ;;  %v2982_v16 = vpack.c.bf16 %v3851_v60, %v3902_v42  ;;  %v2999_v42 = vpack.c.bf16 %v3854_v1, %v4171_v51  ;;  %v4318_v51 = vpack.c.bf16 %v4774_v59, %v3879_v15 }
 0x3b1   : > { %2951 = vmatprep.subr.bf16.mxu1 %v4117_v13  ;;  %2965 = vmatprep.subr.bf16.mxu0 %v2964_v52  ;;  %v3038_v60 = vpack.c.bf16 %v3986_v47, %v3859_v37 }
 0x3b2   : > { %1601 = vmatprep.mubr.f32.mxu0 %v4757_v62 }
 0x3b4   : > { %2953 = vmatpush1.bf16.msra.mxu1 %v4131_v29  ;;  %2967 = vmatpush1.bf16.msra.mxu0 %v2966_v39  ;;  %v3054_v39 = vpack.c.bf16 %v3882_v18, %v3912_v21 }
 0x3b5   : > { %2956 = vmatprep.subr.msk.bf16.mxu1 %vm3459_vm9, %v4243_v31  ;;  %2969 = vmatprep.subr.bf16.mxu0 %v3867_v7 }
 0x3b8   : > { %2959 = vmatpush1.bf16.msk.msra.mxu1 %vm3525_vm14, %v4254_v44  ;;  %2971 = vmatpush1.bf16.msra.mxu0 %v3863_v36 }
 0x3b9   : > { %1482 = vmatprep.subr.mxu1 %v3882_v18  ;;  %2973 = vmatprep.subr.bf16.mxu0 %v4263_v45 }
 0x3bc   : > { %1483 = vmatpush1.msra.mxu1 %v3876_v14  ;;  %2975 = vmatpush1.bf16.msra.mxu0 %v4270_v56 }
 0x3bd   : > { %2678 = vmatmul.mubr.msk.f32.vlgmr.msra.gmra.mrb[20].mxu1 %vm4762_vm3, %v4123_v8  ;;  %2977 = vmatprep.subr.bf16.mxu1 %v4095_v22  ;;  %v2996_v22 = vpack.c.bf16 %v3859_v37, %v4156_v40  ;;  %v4773_v40 = vld [vmem:[#allocation15_spill] sm:$0xff]  ;;  %vm4780_vm3 = vmmov %vm4775_vm2  ;;  %v4783_v37 = vld [vmem:[#allocation6_spill] sm:$0xff] }
 0x3be   : > { %2979 = vmatpush1.bf16.msra.mxu1 %v4112_v49  ;;  %1553 = vmatprep.subr.mxu0 %v3885_v19  ;;  %v1684_v49 = vpop.permute.xlu1 %1683  ;;  %v3114_v26 = vpack.c.bf16 %v4783_v37, %v3879_v15 }
 0x3bf   : > { %2981 = vmatprep.subr.bf16.mxu1 %v2980_v6  ;;  %1672 = vmatprep.mubr.f32.mxu1 %v4757_v62  ;;  %v4328_v9 = vsel %vm4777_vm11, %v1684_v49, 0.0  ;;  %v4343_v61 = vsel %vm4779_vm5, %v1682_v50, %v1684_v49  ;;  %v4786_v6 = vld [vmem:[#allocation13_spill] sm:$0xff]  ;;  %vm4788_vm11 = vmmov %vm4775_vm2  ;;  %v4790_v49 = vld [vmem:[#allocation8_spill] sm:$0xff] }
 0x3c0   : > { %1554 = vmatpush1.msra.mxu0 %v3879_v15  ;;  %v3076_v21 = vpack.c.bf16 %v4328_v9, %v4773_v40  ;;  %vm4791_vm5 = vmmov %vm4775_vm2 }
 0x3c1   : > { %2679 = vmatmul.mubr.msk.f32.vlgmr.msra.gmra.mrb[28].mxu0 %vm4770_vm8, %v4123_v8  ;;  %2993 = vmatprep.subr.bf16.mxu0 %v4149_v41  ;;  %v3005_v41 = vpack.c.bf16 %v4221_v0, %v3910_v25  ;;  %vm4781_vm8 = vmmov %vm4769_vm10 }
 0x3c2   : > { %2983 = vmatpush1.bf16.msra.mxu1 %v2982_v16  ;;  %2995 = vmatpush1.bf16.msra.mxu0 %v4163_v34  ;;  %v4310_v34 = vpack.c.bf16 %v4773_v40, %v3885_v19  ;;  %v3316_v33 = vpop.permute.xlu1 %3315  ;;  %v3056_v16 = vpack.c.bf16 %v3876_v14, %v3910_v25  ;;  %v3073_v25 = vpack.c.bf16 %v3879_v15, %v4221_v0  ;;  %v4802_v15 = vld [vmem:[#allocation3_spill] sm:$0xff] }
 0x3c3   : > { %2985 = vmatprep.subr.bf16.mxu1 %v4186_v27  ;;  %2998 = vmatprep.subr.msk.bf16.mxu0 %vm3656_vm15, %v2996_v22  ;;  %v3318_v17 = vunpack.i.h.bf16 %v3316_v33  ;;  %v3317_v53 = vunpack.i.l.bf16 %v3316_v33  ;;  %v4787_v22 = vld [vmem:[#allocation12_spill] sm:$0xff] }
 0x3c4   : > { %1755 = vmatprep.mubr.f32.mxu0 %v4757_v62 }
 0x3c5   : > { %v4346_v12 = vsel %vm4769_vm10, %v3317_v53, %v3318_v17  ;;  %v4361_v48 = vsel %vm4781_vm8, 0.0, %v3317_v53  ;;  %vm4792_vm10 = vcmask 1039360   ;;  %vm4796_vm8 = vcmask 916480  }
 0x3c6   : > { %2987 = vmatpush1.bf16.msra.mxu1 %v4198_v57  ;;  %3001 = vmatpush1.bf16.msk.msra.mxu0 %vm3681_vm4, %v2999_v42  ;;  %v3028_v52 = vpack.c.bf16 %v4782_v11, %v4346_v12  ;;  %v3031_v47 = vpack.c.bf16 %v4783_v37, %v4361_v48  ;;  %v1986_v0 = vpop.permute.xlu1 %1985  ;;  %v4789_v42 = vld [vmem:[#allocation9_spill] sm:$0xff]  ;;  %v3095_v35 = vpack.c.bf16 %v4361_v48, %v3876_v14 }
 0x3c7   : > { %2989 = vmatprep.subr.bf16.mxu1 %v4771_v5  ;;  %3004 = vmatprep.subr.msk.bf16.mxu0 %vm3497_vm12, %v3002_v43  ;;  %v4428_v43 = vpack.c.bf16 %v4789_v42, %v4786_v6  ;;  %v3112_v14 = vpack.c.bf16 %v4782_v11, %v3885_v19 }
 0x3ca   : > { %2991 = vmatpush1.bf16.msra.mxu1 %v4772_v4  ;;  %3007 = vmatpush1.bf16.msk.msra.mxu0 %vm3509_vm13, %v3005_v41  ;;  %v4436_v41 = vpack.c.bf16 %v4790_v49, %v4787_v22  ;;  %v3326_v17 = vpop.permute.xlu1 %3325 }
 0x3cb   : > { %1624 = vmatprep.subr.mxu1 %v4773_v40  ;;  %3009 = vmatprep.subr.bf16.mxu0 %v4310_v34  ;;  %v3328_v53 = vunpack.i.h.bf16 %v3326_v17 }
 0x3ce   : > { %1625 = vmatpush1.msra.mxu1 %v4774_v59  ;;  %3011 = vmatpush1.bf16.msra.mxu0 %v4318_v51 }
 0x3cf   : > { %2680 = vmatmul.mubr.msk.f32.vlgmr.msra.gmra.mrb[22].mxu1 %vm4775_vm2, %v4123_v8  ;;  %3014 = vmatprep.subr.msk.bf16.mxu1 %vm3459_vm9, %v4776_v20 }
 0x3d0   : > { %3017 = vmatpush1.bf16.msk.msra.mxu1 %vm3525_vm14, %v4778_v55  ;;  %2685 = vmatprep.subr.msk.mxu0 %vm3448_vm7, %v4328_v9  ;;  %v3327_v55 = vunpack.i.l.bf16 %v3326_v17 }
 0x3d1   : > { %3020 = vmatprep.subr.msk.bf16.mxu1 %vm3633_vm1, %v3018_v23  ;;  %1836 = vmatprep.mubr.f32.mxu1 %v4757_v62  ;;  %v3092_v23 = vpack.c.bf16 %v4346_v12, %v3882_v18 }
 0x3d2   : > { %2686 = vmatpush1.msk.msra.mxu0 %vm4766_vm0, %v4343_v61  ;;  %v2080_v50 = vsel %vm4796_vm8, %v3327_v55, %v3328_v53 }
 0x3d3   : > { %2687 = vmatmul.mubr.msk.f32.vlgmr.msra.gmra.mrb[30].mxu0 %vm4780_vm3, %v4123_v8  ;;  %3035 = vmatprep.subr.bf16.mxu0 %v4117_v13  ;;  %v3040_v13 = vpack.c.bf16 %v3969_v32, %v3854_v1  ;;  %v4785_v1 = vld [vmem:[#allocation10_spill] sm:$0xff]  ;;  %vm4795_vm3 = vcmask 924672  }
 0x3d4   : > { %3023 = vmatpush1.bf16.msk.msra.mxu1 %vm4767_vm6, %v3021_v2  ;;  %3037 = vmatpush1.bf16.msra.mxu0 %v4131_v29  ;;  %v4784_v29 = vld [vmem:[#allocation11_spill] sm:$0xff]  ;;  %v4386_v32 = vpack.c.bf16 %v4785_v1, %v4783_v37 }
 0x3d5   : > { %3025 = vmatprep.subr.bf16.mxu1 %v4263_v45  ;;  %3039 = vmatprep.subr.bf16.mxu0 %v3038_v60  ;;  %v4379_v24 = vpack.c.bf16 %v4784_v29, %v4782_v11  ;;  %v3129_v3 = vpack.c.bf16 %v4784_v29, %v4773_v40  ;;  %v3149_v40 = vpack.c.bf16 %v4787_v22, %v4343_v61 }
 0x3d6   : > { %1907 = vmatprep.mubr.f32.mxu0 %v4757_v62 }
 0x3d8   : > { %3027 = vmatpush1.bf16.msra.mxu1 %v4270_v56  ;;  %3041 = vmatpush1.bf16.msra.mxu0 %v3040_v13 }
 0x3d9   : > { %3030 = vmatprep.subr.msk.bf16.mxu1 %vm3459_vm9, %v3028_v52  ;;  %3043 = vmatprep.subr.bf16.mxu0 %v4771_v5 }
 0x3dc   : > { %3033 = vmatpush1.bf16.msk.msra.mxu1 %vm3525_vm14, %v3031_v47  ;;  %3045 = vmatpush1.bf16.msra.mxu0 %v4772_v4  ;;  %v3131_v47 = vpack.c.bf16 %v4785_v1, %v4774_v59 }
 0x3dd   : > { %1788 = vmatprep.subr.mxu1 %v4784_v29  ;;  %3047 = vmatprep.subr.bf16.mxu0 %v4379_v24 }
 0x3e0   : > { %1789 = vmatpush1.msra.mxu1 %v4785_v1  ;;  %3049 = vmatpush1.bf16.msra.mxu0 %v4386_v32 }
 0x3e1   : > { %2694 = vmatmul.mubr.msk.f32.vlgmr.msra.gmra.mrb[24].mxu1 %vm4775_vm2, %v4123_v8  ;;  %3051 = vmatprep.subr.bf16.mxu1 %v3867_v7  ;;  %v3070_v7 = vpack.c.bf16 %v3885_v19, %v4207_v54  ;;  %v3079_v54 = vpack.c.bf16 %v4343_v61, %v4774_v59  ;;  %v4798_v19 = vld [vmem:[#allocation2_spill] sm:$0xff] }
 0x3e2   : > { %3053 = vmatpush1.bf16.msra.mxu1 %v3863_v36  ;;  %1859 = vmatprep.subr.mxu0 %v4786_v6  ;;  %v3062_v36 = vpack.c.bf16 %v4786_v6, %v4784_v29 }
 0x3e3   : > { %3055 = vmatprep.subr.bf16.mxu1 %v3054_v39  ;;  %1978 = vmatprep.mubr.f32.mxu1 %v4757_v62 }
 0x3e4   : > { %1860 = vmatpush1.msra.mxu0 %v4787_v22 }
 0x3e5   : > { %2695 = vmatmul.mubr.msk.f32.vlgmr.msra.gmra.mrb[32].mxu0 %vm4788_vm11, %v4123_v8  ;;  %3067 = vmatprep.subr.bf16.mxu0 %v4186_v27  ;;  %v3064_v27 = vpack.c.bf16 %v4787_v22, %v4785_v1  ;;  %vm4800_vm11 = vmmov %vm4796_vm8 }
 0x3e6   : > { %3057 = vmatpush1.bf16.msra.mxu1 %v3056_v16  ;;  %3069 = vmatpush1.bf16.msra.mxu0 %v4198_v57  ;;  %v1988_v57 = vpop.permute.xlu0 %1987 }
 0x3e7   : > { %3059 = vmatprep.subr.bf16.mxu1 %v4310_v34  ;;  %3072 = vmatprep.subr.msk.bf16.mxu0 %vm3656_vm15, %v3070_v7  ;;  %v4446_v20 = vsel %vm4792_vm10, %v1988_v57, 0.0 }
 0x3e8   : > { %2059 = vmatprep.mubr.f32.mxu0 %v4757_v62  ;;  %v3152_v59 = vpack.c.bf16 %v4446_v20, %v4789_v42 }
 0x3ea   : > { %3061 = vmatpush1.bf16.msra.mxu1 %v4318_v51  ;;  %3075 = vmatpush1.bf16.msk.msra.mxu0 %vm3681_vm4, %v3073_v25  ;;  %v3321_v33 = vpop.permute.xlu0 %3320 }
 0x3eb   : > { %3063 = vmatprep.subr.bf16.mxu1 %v3062_v36  ;;  %3078 = vmatprep.subr.msk.bf16.mxu0 %vm3497_vm12, %v3076_v21  ;;  %v3322_v18 = vunpack.i.l.bf16 %v3321_v33  ;;  %v3323_v10 = vunpack.i.h.bf16 %v3321_v33 }
 0x3ee   : > { %3065 = vmatpush1.bf16.msra.mxu1 %v3064_v27  ;;  %3081 = vmatpush1.bf16.msk.msra.mxu0 %vm3509_vm13, %v3079_v54  ;;  %v2087_v60 = vpop.permute.xlu0 %2086 }
 0x3ef   : > { %1930 = vmatprep.subr.mxu1 %v4789_v42  ;;  %3083 = vmatprep.subr.bf16.mxu0 %v4428_v43 }
 0x3f2   : > { %1931 = vmatpush1.msra.mxu1 %v4790_v49  ;;  %3085 = vmatpush1.bf16.msra.mxu0 %v4436_v41  ;;  %v2168_v37 = vpop.permute.xlu0 %2167 }
 0x3f3   : > { %2696 = vmatmul.mubr.msk.f32.vlgmr.msra.gmra.mrb[26].mxu1 %vm4791_vm5, %v4123_v8  ;;  %3088 = vmatprep.subr.msk.bf16.mxu1 %vm3459_vm9, %v4243_v31  ;;  %vm4793_vm9 = vmmov %vm4792_vm10  ;;  %vm4803_vm10 = vnez %v4802_v15 }
 0x3f4   : > { %3091 = vmatpush1.bf16.msk.msra.mxu1 %vm3525_vm14, %v4254_v44  ;;  %2701 = vmatprep.subr.msk.mxu0 %vm3448_vm7, %v4446_v20  ;;  %v4461_v31 = vsel %vm4793_vm9, %v1986_v0, %v1988_v57  ;;  %v2073_v44 = vsel %vm4795_vm3, %v3322_v18, 0.0  ;;  %vm4801_vm5 = vmmov %vm4796_vm8 }
 0x3f5   : > { %3094 = vmatprep.subr.msk.bf16.mxu1 %vm3633_vm1, %v3092_v23  ;;  %2158 = vmatprep.mubr.f32.mxu1 %v4757_v62  ;;  %vm4794_vm1 = vmmov %vm4775_vm2  ;;  %v3102_v2 = vpack.c.bf16 %v3328_v53, %v2073_v44  ;;  %vm4799_vm2 = vnez %v4798_v19  ;;  %v3155_v28 = vpack.c.bf16 %v4461_v31, %v4790_v49 }
 0x3f6   : > { %2702 = vmatpush1.msk.msra.mxu0 %vm4766_vm0, %v4461_v31  ;;  %vm4804_vm9 = vmmov %vm4794_vm1 }
 0x3f7   : > { %2703 = vmatmul.mubr.msk.f32.vlgmr.msra.gmra.mrb[34].mxu0 %vm4794_vm1, %v4123_v8  ;;  %3109 = vmatprep.subr.bf16.mxu0 %v4263_v45  ;;  %vm4806_vm1 = vmmov %vm4801_vm5 }
 0x3f8   : > { %3097 = vmatpush1.bf16.msk.msra.mxu1 %vm4767_vm6, %v3095_v35  ;;  %3111 = vmatpush1.bf16.msra.mxu0 %v4270_v56  ;;  %vm4797_vm6 = vmmov %vm4795_vm3  ;;  %v2089_v56 = vpop.permute.xlu1 %2088 }
 0x3f9   : > { %3099 = vmatprep.subr.bf16.mxu1 %v4379_v24  ;;  %3113 = vmatprep.subr.bf16.mxu0 %v3112_v14  ;;  %v2070_v45 = vsel %vm4797_vm6, %v3323_v10, %v3322_v18  ;;  %v3120_v48 = vpack.c.bf16 %v2089_v56, %v3328_v53  ;;  %v2090_v11 = vsel %vm4801_vm5, %v2087_v60, %v2089_v56  ;;  %vm4807_vm3 = vmmov %vm4804_vm9 }
 0x3fa   : > { %2239 = vmatprep.mubr.f32.mxu0 %v4757_v62  ;;  %v3105_v12 = vpack.c.bf16 %v2080_v50, %v2070_v45  ;;  %v3123_v52 = vpack.c.bf16 %v2090_v11, %v2080_v50  ;;  %vm4809_vm8 = vmmov %vm4806_vm1 }
 0x3fc   : > { %3101 = vmatpush1.bf16.msra.mxu1 %v4386_v32  ;;  %3115 = vmatpush1.bf16.msra.mxu0 %v3114_v26  ;;  %v2170_v13 = vpop.permute.xlu1 %2169 }
 0x3fd   : > { %3104 = vmatprep.subr.msk.bf16.mxu1 %vm4799_vm2, %v3102_v2  ;;  %3117 = vmatprep.subr.bf16.mxu0 %v3062_v36  ;;  %v2171_v24 = vsel %vm4806_vm1, %v2168_v37, %v2170_v13 }
 0x400   : > { %3107 = vmatpush1.bf16.msk.msra.mxu1 %vm3525_vm14, %v3105_v12  ;;  %3119 = vmatpush1.bf16.msra.mxu0 %v3064_v27  ;;  %vm4805_vm14 = vmmov %vm4801_vm5 }
 0x401   : > { %2711 = vmatprep.subr.msk.mxu1 %vm4800_vm11, %v2089_v56  ;;  %3122 = vmatprep.subr.msk.bf16.mxu0 %vm4803_vm10, %v3120_v48 }
 0x404   : > { %2111 = vmatpush1.msra.mxu1 %v2090_v11  ;;  %3124 = vmatpush1.bf16.msra.mxu0 %v3123_v52 }
 0x405   : > { %2712 = vmatmul.mubr.msk.f32.vlgmr.msra.gmra.mrb[28].mxu1 %vm4804_vm9, %v4123_v8  ;;  %3126 = vmatprep.subr.bf16.mxu1 %v4771_v5  ;;  %v3146_v5 = vpack.c.bf16 %v4786_v6, %v4328_v9  ;;  %v2247_v9 = vpop.permute.xlu0 %2246 }
 0x406   : > { %3128 = vmatpush1.bf16.msra.mxu1 %v4772_v4  ;;  %2715 = vmatprep.subr.msk.mxu0 %vm4805_vm14, %v2170_v13  ;;  %v3137_v4 = vpack.c.bf16 %v2170_v13, %v2089_v56 }
 0x407   : > { %3130 = vmatprep.subr.bf16.mxu1 %v3129_v3  ;;  %2318 = vmatprep.mubr.f32.mxu1 %v4757_v62 }
 0x408   : > { %2192 = vmatpush1.msra.mxu0 %v2171_v24 }
 0x409   : > { %2716 = vmatmul.mubr.msk.f32.vlgmr.msra.gmra.mrb[36].mxu0 %vm4807_vm3, %v4123_v8  ;;  %3143 = vmatprep.subr.bf16.mxu0 %v4310_v34  ;;  %v2249_v34 = vpop.permute.xlu1 %2248  ;;  %v2328_v29 = vpop.permute.xlu0 %2327 }
 0x40a   : > { %3132 = vmatpush1.bf16.msra.mxu1 %v3131_v47  ;;  %3145 = vmatpush1.bf16.msra.mxu0 %v4318_v51  ;;  %v3140_v51 = vpack.c.bf16 %v2171_v24, %v2090_v11  ;;  %v2250_v61 = vsel %vm4809_vm8, %v2247_v9, %v2249_v34 }
 0x40b   : > { %3134 = vmatprep.subr.bf16.mxu1 %v4428_v43  ;;  %3148 = vmatprep.subr.msk.bf16.mxu0 %vm3656_vm15, %v3146_v5  ;;  %vm4808_vm15 = vmmov %vm4806_vm1  ;;  %v3161_v58 = vpack.c.bf16 %v2250_v61, %v2171_v24 }
 0x40c   : > { %2399 = vmatprep.mubr.f32.mxu0 %v4757_v62  ;;  %v3158_v62 = vpack.c.bf16 %v2249_v34, %v2170_v13 }
 0x40d   : > { %v2326_v1 = vpop.permute.xlu1 %2325  ;;  %v4541_v63 = vpop.permute.xlu0 %1112 }
 0x40e   : > { %3136 = vmatpush1.bf16.msra.mxu1 %v4436_v41  ;;  %3151 = vmatpush1.bf16.msk.msra.mxu0 %vm3681_vm4, %v3149_v40  ;;  %vm4811_vm4 = vcmask 908288  }
 0x40f   : > { %3139 = vmatprep.subr.msk.bf16.mxu1 %vm4803_vm10, %v3137_v4  ;;  %3154 = vmatprep.subr.msk.bf16.mxu0 %vm3497_vm12, %v3152_v59  ;;  %vm4810_vm12 = vmmov %vm4807_vm3  ;;  %v2332_v46 = vsel %vm4811_vm4, %v2328_v29, 0.0 }
 0x410   : > { %vm4812_vm6 = vmmov %vm4811_vm4 }
 0x411   : > { %v2329_v32 = vsel %vm4812_vm6, %v2326_v1, %v2328_v29 }
 0x412   : > { %3141 = vmatpush1.bf16.msra.mxu1 %v3140_v51  ;;  %3157 = vmatpush1.bf16.msk.msra.mxu0 %vm3509_vm13, %v3155_v28  ;;  %vm4813_vm13 = vmmov %vm4807_vm3 }
 0x413   : > { %2719 = vmatprep.subr.msk.mxu1 %vm4808_vm15, %v2249_v34  ;;  %3160 = vmatprep.subr.msk.bf16.mxu0 %vm4803_vm10, %v3158_v62 }
 0x416   : > { %2271 = vmatpush1.msra.mxu1 %v2250_v61  ;;  %3162 = vmatpush1.bf16.msra.mxu0 %v3161_v58 }
 0x417   : > { %2720 = vmatmul.mubr.msk.f32.vlgmr.msra.gmra.mrb[30].mxu1 %vm4810_vm12, %v4123_v8  ;;  %2727 = vmatprep.subr.msk.mxu0 %vm3448_vm7, %v2332_v46 }
 0x41a   : > { %2728 = vmatpush1.msk.msra.mxu0 %vm4766_vm0, %v2329_v32 }
 0x41b   : > { %2729 = vmatmul.mubr.msk.f32.vlgmr.msra.gmra.mrb[38].mxu0 %vm4813_vm13, %v4123_v8 }
 0x46c   : > { %v1184_v39 = vpop.f32.mrb[16].mxu1 }
 0x46d   : > { %v1185_v6 = vadd.f32 %v1184_v39, %v4541_v63  ;;  %v1186_v16 = vpop.f32.mrb[17].mxu1 }
 0x46e   : > { %v1187_v22 = vadd.f32 %v1186_v16, %v4541_v63 }
 0x470   : > { %v2408_v30 = vcombine.low %v1185_v6, %v1187_v22  ;;  %v1265_v38 = vpop.f32.mrb[24].mxu0 }
 0x471   : > { %v1266_v8 = vadd.f32 %v1265_v38, %v4541_v63  ;;  %v1267_v7 = vpop.f32.mrb[25].mxu0 }
 0x472   : > { %2410 = vst [vmem:[%s4548_s14] sm:$0x77] %v2408_v30  ;;  %v1268_v36 = vadd.f32 %v1267_v7, %v4541_v63 }
 0x474   : > { %v2413_v25 = vcombine.low %v1266_v8, %v1268_v36 }
 0x476   : > { %2730 = vst [vmem:[%s4548_s14 + $0x8] sm:$0x77] %v2413_v25 }
 0x47e   : > { %v1344_v21 = vpop.f32.mrb[18].mxu1 }
 0x47f   : > { %v1345_v27 = vadd.f32 %v1344_v21, %v4541_v63  ;;  %v1346_v57 = vpop.f32.mrb[19].mxu1 }
 0x480   : > { %v1347_v54 = vadd.f32 %v1346_v57, %v4541_v63 }
 0x482   : > { %v2419_v0 = vcombine.low %v1345_v27, %v1347_v54  ;;  %v1449_v42 = vpop.f32.mrb[26].mxu0 }
 0x483   : > { %v1450_v43 = vadd.f32 %v1449_v42, %v4541_v63  ;;  %v1451_v49 = vpop.f32.mrb[27].mxu0 }
 0x484   : > { %2731 = vst [vmem:[%s4548_s14 + $0x10] sm:$0x77] %v2419_v0  ;;  %v1452_v41 = vadd.f32 %v1451_v49, %v4541_v63 }
 0x486   : > { %v2425_v33 = vcombine.low %v1450_v43, %v1452_v41 }
 0x488   : > { %2732 = vst [vmem:[%s4548_s14 + $0x18] sm:$0x77] %v2425_v33 }
 0x490   : > { %v1532_v23 = vpop.f32.mrb[20].mxu1 }
 0x491   : > { %v1533_v20 = vadd.f32 %v1532_v23, %v4541_v63  ;;  %v1534_v17 = vpop.f32.mrb[21].mxu1 }
 0x492   : > { %v1535_v18 = vadd.f32 %v1534_v17, %v4541_v63 }
 0x494   : > { %v2431_v35 = vcombine.low %v1533_v20, %v1535_v18  ;;  %v1603_v31 = vpop.f32.mrb[28].mxu0 }
 0x495   : > { %v1604_v53 = vadd.f32 %v1603_v31, %v4541_v63  ;;  %v1605_v55 = vpop.f32.mrb[29].mxu0 }
 0x496   : > { %2733 = vst [vmem:[%s4548_s14 + $0x20] sm:$0x77] %v2431_v35  ;;  %v1606_v10 = vadd.f32 %v1605_v55, %v4541_v63 }
 0x498   : > { %v2437_v14 = vcombine.low %v1604_v53, %v1606_v10 }
 0x49a   : > { %2734 = vst [vmem:[%s4548_s14 + $0x28] sm:$0x77] %v2437_v14 }
 0x4a2   : > { %v1674_v44 = vpop.f32.mrb[22].mxu1 }
 0x4a3   : > { %v1675_v2 = vadd.f32 %v1674_v44, %v4541_v63  ;;  %v1676_v50 = vpop.f32.mrb[23].mxu1 }
 0x4a4   : > { %v1677_v26 = vadd.f32 %v1676_v50, %v4541_v63 }
 0x4a6   : > { %v2443_v45 = vcombine.low %v1675_v2, %v1677_v26  ;;  %v1757_v19 = vpop.f32.mrb[30].mxu0 }
 0x4a7   : > { %v1758_v12 = vadd.f32 %v1757_v19, %v4541_v63  ;;  %v1759_v56 = vpop.f32.mrb[31].mxu0 }
 0x4a8   : > { %2735 = vst [vmem:[%s4548_s14 + $0x30] sm:$0x77] %v2443_v45  ;;  %v1760_v60 = vadd.f32 %v1759_v56, %v4541_v63 }
 0x4aa   : > { %v2449_v48 = vcombine.low %v1758_v12, %v1760_v60 }
 0x4ac   : > { %2736 = vst [vmem:[%s4548_s14 + $0x38] sm:$0x77] %v2449_v48 }
 0x4b4   : > { %v1838_v11 = vpop.f32.mrb[24].mxu1 }
 0x4b5   : > { %v1839_v15 = vadd.f32 %v1838_v11, %v4541_v63  ;;  %v1840_v52 = vpop.f32.mrb[25].mxu1 }
 0x4b6   : > { %v1841_v3 = vadd.f32 %v1840_v52, %v4541_v63 }
 0x4b8   : > { %v2455_v13 = vcombine.low %v1839_v15, %v1841_v3  ;;  %v1909_v37 = vpop.f32.mrb[32].mxu0 }
 0x4b9   : > { %v1910_v47 = vadd.f32 %v1909_v37, %v4541_v63  ;;  %v1911_v24 = vpop.f32.mrb[33].mxu0 }
 0x4ba   : > { %2737 = vst [vmem:[%s4548_s14 + $0x40] sm:$0x77] %v2455_v13  ;;  %v1912_v5 = vadd.f32 %v1911_v24, %v4541_v63 }
 0x4bc   : > { %v2461_v4 = vcombine.low %v1910_v47, %v1912_v5 }
 0x4be   : > { %2738 = vst [vmem:[%s4548_s14 + $0x48] sm:$0x77] %v2461_v4 }
 0x4c6   : > { %v1980_v40 = vpop.f32.mrb[26].mxu1 }
 0x4c7   : > { %v1981_v59 = vadd.f32 %v1980_v40, %v4541_v63  ;;  %v1982_v9 = vpop.f32.mrb[27].mxu1 }
 0x4c8   : > { %v1983_v34 = vadd.f32 %v1982_v9, %v4541_v63 }
 0x4ca   : > { %v2467_v51 = vcombine.low %v1981_v59, %v1983_v34  ;;  %v2061_v28 = vpop.f32.mrb[34].mxu0 }
 0x4cb   : > { %v2062_v62 = vadd.f32 %v2061_v28, %v4541_v63  ;;  %v2063_v61 = vpop.f32.mrb[35].mxu0 }
 0x4cc   : > { %2739 = vst [vmem:[%s4548_s14 + $0x50] sm:$0x77] %v2467_v51  ;;  %v2064_v29 = vadd.f32 %v2063_v61, %v4541_v63 }
 0x4ce   : > { %v2473_v58 = vcombine.low %v2062_v62, %v2064_v29 }
 0x4d0   : > { %2740 = vst [vmem:[%s4548_s14 + $0x58] sm:$0x77] %v2473_v58 }
 0x4d8   : > { %v2160_v46 = vpop.f32.mrb[28].mxu1 }
 0x4d9   : > { %v2161_v1 = vadd.f32 %v2160_v46, %v4541_v63  ;;  %v2162_v32 = vpop.f32.mrb[29].mxu1 }
 0x4da   : > { %v2163_v39 = vadd.f32 %v2162_v32, %v4541_v63 }
 0x4dc   : > { %v2479_v6 = vcombine.low %v2161_v1, %v2163_v39  ;;  %v2241_v16 = vpop.f32.mrb[36].mxu0 }
 0x4dd   : > { %v2242_v22 = vadd.f32 %v2241_v16, %v4541_v63  ;;  %v2243_v30 = vpop.f32.mrb[37].mxu0 }
 0x4de   : > { %2741 = vst [vmem:[%s4548_s14 + $0x60] sm:$0x77] %v2479_v6  ;;  %v2244_v38 = vadd.f32 %v2243_v30, %v4541_v63 }
 0x4e0   : > { %v2485_v8 = vcombine.low %v2242_v22, %v2244_v38 }
 0x4e2   : > { %2742 = vst [vmem:[%s4548_s14 + $0x68] sm:$0x77] %v2485_v8 }
 0x4ea   : > { %v2320_v7 = vpop.f32.mrb[30].mxu1 }
 0x4eb   : > { %v2321_v36 = vadd.f32 %v2320_v7, %v4541_v63  ;;  %v2322_v25 = vpop.f32.mrb[31].mxu1 }
 0x4ec   : > { %v2323_v21 = vadd.f32 %v2322_v25, %v4541_v63 }
 0x4ee   : > { %v2491_v27 = vcombine.low %v2321_v36, %v2323_v21  ;;  %v2401_v57 = vpop.f32.mrb[38].mxu0 }
 0x4ef   : > { %v2402_v54 = vadd.f32 %v2401_v57, %v4541_v63  ;;  %v2403_v0 = vpop.f32.mrb[39].mxu0 }
 0x4f0   : > { %2743 = vst [vmem:[%s4548_s14 + $0x70] sm:$0x77] %v2491_v27  ;;  %v2404_v42 = vadd.f32 %v2403_v0, %v4541_v63 }
 0x4f2   : > { %v2497_v43 = vcombine.low %v2402_v54, %v2404_v42 }
 0x4f4   : > { %2744 = vst [vmem:[%s4548_s14 + $0x78] sm:$0x77] %v2497_v43 }
 0x4f5 PF: > { %s17_s24 = sadd.s32 1, %s3335_s24  }
 0x4f6   : > { %p14_p4 = scmp.ge.s32.totalorder %s17_s24, 4  }
 0x4f8   :  { %16 = sbr.rel (!%p14_p4) target bundleno = 1 (0x1), region = 93 }

</bundles_post_ra>
